<compile_context>
chip_gen: v6e
topology: v6e:2x2x1
jax: 0.10.0
libtpu: 0.0.40
codegen_flags: <defaults>
</compile_context>

<pallas_src>
import jax
import jax.numpy as jnp
from jax import lax
from jax.experimental import pallas as pl
from jax.experimental.pallas import tpu as pltpu

NUM_IMAGES_WARM = 12800  # region_target_loss.NUM_IMAGES_WARM
_N_TARGET_ROWS = 8       # tx, ty, tw, th, coord_w, t_obj, obj_w, cls_id


# --------------------------------------------------------------------------------------
# Pallas kernel: fused elementwise loss, lane-wise partial accumulation (no XLU scatter).
# --------------------------------------------------------------------------------------
def _make_yolo_loss_kernel(class_scale):
    class_scale = float(class_scale)

    def kernel(x_ref, t_ref, out_ref):
        # x_ref  : (Gb, 5+C, T)  raw predictions for Gb (batch,anchor) groups, one lane-tile
        # t_ref  : (Gb, 8,   T)  packed dense targets
        # out_ref: (Gb, 1, 128)  per-group-block lane-folded partial sums (reduced outside)
        @pl.when(pl.program_id(1) == 0)
        def _init():
            out_ref[...] = jnp.zeros_like(out_ref)

        p = x_ref[...].astype(jnp.float32)        # upcast in-register (bf16 friendly)
        t = t_ref[...]
        tile = p.shape[-1]

        txy, twh = t[:, 0:2], t[:, 2:4]
        cw, tobj = t[:, 4:5], t[:, 5:6]
        ow = t[:, 6:7]
        cid = t[:, 7:8].astype(jnp.int32)         # (Gb, 1, T) class ids (read where tobj>0)

        # sigmoid over rows 0:5 in ONE EUP exp pass (wh rows discarded); approx reciprocal
        # keeps this off the VALU critical path (relative error ~1e-3 vs exact).
        sig = pl.reciprocal(1.0 + jnp.exp(-p[:, 0:5]), approx=True)
        pxy, pobj = sig[:, 0:2], sig[:, 4:5]
        pwh, pcls = p[:, 2:4], p[:, 5:]

        # coordinate + objectness losses, kept per-lane
        coord = cw * jnp.sum((pxy - txy) ** 2 + (pwh - twh) ** 2,
                             axis=1, keepdims=True)                       # (Gb, 1, T)
        obj = ow * (pobj - tobj) ** 2                                     # (Gb, 1, T)

        # softmax cross-entropy against the sparse class id; weight class_scale*t_obj
        m = jnp.max(pcls, axis=1, keepdims=True)
        lse = m + jnp.log(jnp.sum(jnp.exp(pcls - m), axis=1, keepdims=True))
        row = lax.broadcasted_iota(jnp.int32, pcls.shape, 1)
        sel = jnp.sum(jnp.where(row == cid, pcls, 0.0), axis=1, keepdims=True)
        cls_l = (class_scale * tobj) * (lse - sel)                        # (Gb, 1, T)

        loss = coord + obj + cls_l                                        # (Gb, 1, T)

        # fold lane chunks with pure VPU adds into the (Gb, 1, 128) accumulator; the
        # single cross-lane reduction happens once outside the kernel (jnp.sum).
        part = loss[:, :, 0:128]
        for k in range(1, tile // 128):
            part = part + loss[:, :, k * 128:(k + 1) * 128]
        out_ref[...] += part

    return kernel


# --------------------------------------------------------------------------------------
# Tiling heuristics.
# --------------------------------------------------------------------------------------
def _pick_tile(hw_pad, bytes_per_lane, budget=256 << 10):
    """Largest multiple-of-128 lane tile dividing hw_pad within a per-group byte budget."""
    max_lanes = max(128, budget // max(bytes_per_lane, 1))
    if hw_pad <= max_lanes:
        return hw_pad
    best = 128
    cand = 256
    while cand <= max_lanes:
        if hw_pad % cand == 0:
            best = cand
        cand += 128
    return best


def _pick_group_block(G, bytes_per_group, budget=1 << 20):
    """Block 8-32 (batch,anchor) groups per grid step (~1 MiB x+target block), keeping
    >= 2 leading-grid blocks for v7x's two TensorCores whenever G permits."""
    gb = max(8, min(32, budget // max(bytes_per_group, 1)))
    gb = (gb // 8) * 8
    while gb > 8 and pl.cdiv(G, gb) < 2:
        gb -= 8
    return gb


def _run_loss_kernel(xr, targets, gb, tile, class_scale):
    G_pad, P, HW_pad = xr.shape
    n_gb = G_pad // gb
    n_tiles = HW_pad // tile
    x_itemsize = jnp.dtype(xr.dtype).itemsize

    # actual double-buffered working set (inputs + tiny output block), modest headroom;
    # capped well below v7x's 64 MiB per-TC VMEM.
    block_in = gb * (P * tile * x_itemsize + _N_TARGET_ROWS * tile * 4)
    needed = 2 * block_in + 2 * gb * 128 * 4
    vmem_limit = int(min(max(4 * needed, 8 << 20), 16 << 20))

    partials = pl.pallas_call(
        _make_yolo_loss_kernel(class_scale),
        out_shape=jax.ShapeDtypeStruct((G_pad, 1, 128), jnp.float32),
        grid=(n_gb, n_tiles),
        in_specs=[
            pl.BlockSpec((gb, P, tile), lambda g, i: (g, 0, i)),
            pl.BlockSpec((gb, _N_TARGET_ROWS, tile), lambda g, i: (g, 0, i)),
        ],
        out_specs=pl.BlockSpec((gb, 1, 128), lambda g, i: (g, 0, 0)),
        compiler_params=pltpu.CompilerParams(
            dimension_semantics=("parallel", "arbitrary"),
            vmem_limit_bytes=vmem_limit,
        ),
    )(xr, targets)
    return jnp.sum(partials)


# --------------------------------------------------------------------------------------
# Glue: build packed region targets (B*A, 8, H*W) from labels with one fused scatter.
# --------------------------------------------------------------------------------------
def _build_targets(label, anchors, B, A, H, W, C,
                   coord_scale, object_scale, noobject_scale, warm):
    f32 = jnp.float32
    G, HW = B * A, H * W

    cls_id = jnp.clip(label[..., 0].astype(jnp.int32), 0, C - 1)          # (B, M)
    cx, cy = label[..., 1], label[..., 2]
    bw, bh = label[..., 3], label[..., 4]
    valid = (bw > 0) & (bh > 0)

    gi = jnp.clip(jnp.floor(cx * W).astype(jnp.int32), 0, W - 1)          # column (x)
    gj = jnp.clip(jnp.floor(cy * H).astype(jnp.int32), 0, H - 1)          # row    (y)

    # best anchor by centered IoU on (w*W, h*H)
    gw, gh = bw * W, bh * H
    aw, ah = anchors[:, 0], anchors[:, 1]
    inter = jnp.minimum(gw[..., None], aw) * jnp.minimum(gh[..., None], ah)
    union = gw[..., None] * gh[..., None] + aw * ah - inter
    iou = inter / jnp.maximum(union, 1e-12)
    best_a = jnp.argmax(iou, axis=-1).astype(jnp.int32)                   # (B, M)

    aw_b, ah_b = aw[best_a], ah[best_a]
    tx, ty = cx * W - gi, cy * H - gj
    tw = jnp.log(jnp.maximum(gw, 1e-12) / aw_b)
    th = jnp.log(jnp.maximum(gh, 1e-12) / ah_b)
    cwt = coord_scale * (2.0 - bw * bh)

    b_idx = jnp.broadcast_to(jnp.arange(B, dtype=jnp.int32)[:, None], best_a.shape)
    group = jnp.where(valid, b_idx * A + best_a, G)                       # OOB -> dropped
    cell = gj * W + gi

    ones = jnp.ones_like(tx)
    upd = jnp.stack(
        [tx, ty, tw, th, cwt, ones, object_scale * ones, cls_id.astype(f32)],
        axis=-1)                                                          # (B, M, 8)

    # dense background defaults per row (warm-up pushes boxes towards cell centers)
    fill = jnp.array(
        [0.5 if warm else 0.0, 0.5 if warm else 0.0, 0.0, 0.0,
         0.01 if warm else 0.0, 0.0, noobject_scale, 0.0], f32)
    tgt = jnp.broadcast_to(fill[None, :, None], (G, _N_TARGET_ROWS, HW))
    tgt = tgt.at[group.reshape(-1), :, cell.reshape(-1)].set(
        upd.reshape(-1, _N_TARGET_ROWS).astype(f32), mode="drop")
    return tgt


# --------------------------------------------------------------------------------------
# Module-equivalent wrapper (mirrors mtorch YoloLoss API).
# --------------------------------------------------------------------------------------
class YoloLoss:
    # standard YOLO v2 anchor priors (grid units), deterministic "parameters"
    _ANCHORS = jnp.array(
        [[1.08, 1.19], [3.42, 4.41], [6.63, 11.38], [9.42, 5.11], [16.62, 10.52]],
        dtype=jnp.float32,
    )

    def __init__(self, num_classes, seen_images=NUM_IMAGES_WARM,
                 coord_scale=1.0, object_scale=5.0, noobject_scale=1.0, class_scale=1.0):
        self._num_classes = num_classes
        self._seen_images = seen_images
        self._coord_scale = coord_scale
        self._object_scale = object_scale
        self._noobject_scale = noobject_scale
        self._class_scale = class_scale
        self._criterion = jax.jit(self._criterion_fn)

    @property
    def criterion(self):
        return self._criterion

    @property
    def num_classes(self):
        return self._num_classes

    @property
    def seen_images(self):
        return self._seen_images

    @property
    def normalization(self):
        return "batch_size"

    def _criterion_fn(self, x, label):
        B, ch, H, W = x.shape
        C = self._num_classes
        A = self._ANCHORS.shape[0]
        P = 5 + C
        assert ch == A * P
        G, HW = B * A, H * W

        # NCHW -> (B*A, 5+C, H*W): pure reshapes (channel axis splits contiguously),
        # no materialized transpose; x keeps its input dtype (bf16 ok), upcast in-kernel.
        xr = x.reshape(B, A, P, H, W).reshape(G, P, HW)

        targets = _build_targets(
            label.astype(jnp.float32), self._ANCHORS, B, A, H, W, C,
            self._coord_scale, self._object_scale, self._noobject_scale,
            warm=self._seen_images < NUM_IMAGES_WARM,
        )

        # lane-dense padding of the cell axis + group padding to a multiple of the group
        # block; padded lanes/groups have all-zero target weights -> contribute exactly 0.
        x_itemsize = jnp.dtype(x.dtype).itemsize
        HW_pad = pl.cdiv(HW, 128) * 128
        tile = _pick_tile(HW_pad, P * x_itemsize + _N_TARGET_ROWS * 4)
        gb = _pick_group_block(G, P * tile * x_itemsize + _N_TARGET_ROWS * tile * 4)
        G_pad = pl.cdiv(G, gb) * gb
        if HW_pad != HW or G_pad != G:
            xr = jnp.pad(xr, ((0, G_pad - G), (0, 0), (0, HW_pad - HW)))
            targets = jnp.pad(targets, ((0, G_pad - G), (0, 0), (0, HW_pad - HW)))

        return _run_loss_kernel(xr, targets, gb, tile, self._class_scale) / B

    def forward(self, x, label):
        return self.criterion(x, label)

    __call__ = forward

    def __repr__(self):
        return "Yolo v2 Loss"


if __name__ == "__main__":
    key = jax.random.PRNGKey(0)
    B, C, A, H, W, M = 2, 4, 5, 16, 16, 6

    k1, k2, k3, k4, k5 = jax.random.split(key, 5)
    # network output, PyTorch NCHW layout: (B, A*(5+C), H, W) = (2, 45, 16, 16)
    x = jax.random.normal(k1, (B, A * (5 + C), H, W), jnp.float32)

    # ground truth: (class, cx, cy, w, h), normalized; some boxes zeroed out (padding)
    cls = jax.random.randint(k2, (B, M, 1), 0, C).astype(jnp.float32)
    cxy = jax.random.uniform(k3, (B, M, 2), minval=0.05, maxval=0.95)
    wh = jax.random.uniform(k4, (B, M, 2), minval=0.05, maxval=0.5)
    keep = (jax.random.uniform(k5, (B, M, 1)) > 0.3).astype(jnp.float32)
    label = jnp.concatenate([cls, cxy, wh * keep], axis=-1)

    loss_fn = YoloLoss(num_classes=C)
    loss = loss_fn(x, label)
    jax.block_until_ready(loss)
    assert loss.shape == () and bool(jnp.isfinite(loss))
    print("KERNEL_OK")
</pallas_src>

<mosaic_0001>
module attributes {stable_mosaic.version = 11 : i64} {
  func.func @kernel(%arg0: i32, %arg1: i32, %arg2: memref<8x9x256xf32, #tpu.memory_space<vmem>>, %arg3: memref<8x8x256xf32, #tpu.memory_space<vmem>>, %arg4: memref<8x1x128xf32, #tpu.memory_space<vmem>>) attributes {dimension_semantics = [#tpu.dimension_semantics<parallel>, #tpu.dimension_semantics<arbitrary>], iteration_bounds = array<i64: 2, 1>, scalar_prefetch = 0 : i64, scratch_operands = 0 : i64, tpu.core_type = #tpu.core_type<tc>, window_params = [{transform_indices = @transform_0, window_bounds = array<i64: 8, 9, 256>}, {transform_indices = @transform_1, window_bounds = array<i64: 8, 8, 256>}, {transform_indices = @transform_2, window_bounds = array<i64: 8, 1, 128>}]} {
    %c0_i32 = arith.constant 0 : i32
    %0 = arith.cmpi eq, %arg1, %c0_i32 : i32
    %1 = arith.extui %0 : i1 to i32
    %c0_i32_0 = arith.constant 0 : i32
    %2 = arith.cmpi ne, %1, %c0_i32_0 : i32
    scf.if %2 {
      %cst_19 = arith.constant 0.000000e+00 : f32
      %62 = vector.broadcast %cst_19 : f32 to vector<8x1x128xf32>
      %c0_20 = arith.constant 0 : index
      %c0_21 = arith.constant 0 : index
      %c0_22 = arith.constant 0 : index
      %63 = vector.load %arg4[%c0_20, %c0_21, %c0_22] : memref<8x1x128xf32, #tpu.memory_space<vmem>>, vector<8x1x128xf32>
      tpu.vector_store %arg4[%c0_20, %c0_21, %c0_22], %62 {strides = array<i32>} : memref<8x1x128xf32, #tpu.memory_space<vmem>>, vector<8x1x128xf32>,
    } else {
    }
    %c0 = arith.constant 0 : index
    %c0_1 = arith.constant 0 : index
    %c0_2 = arith.constant 0 : index
    %3 = vector.load %arg2[%c0, %c0_1, %c0_2] : memref<8x9x256xf32, #tpu.memory_space<vmem>>, vector<8x9x256xf32>
    %c0_3 = arith.constant 0 : index
    %c0_4 = arith.constant 0 : index
    %c0_5 = arith.constant 0 : index
    %4 = vector.load %arg3[%c0_3, %c0_4, %c0_5] : memref<8x8x256xf32, #tpu.memory_space<vmem>>, vector<8x8x256xf32>
    %5 = vector.extract_strided_slice %4 {offsets = [0, 0, 0], sizes = [8, 2, 256], strides = [1, 1, 1]} : vector<8x8x256xf32> to vector<8x2x256xf32>
    %6 = vector.extract_strided_slice %4 {offsets = [0, 2, 0], sizes = [8, 2, 256], strides = [1, 1, 1]} : vector<8x8x256xf32> to vector<8x2x256xf32>
    %7 = vector.extract_strided_slice %4 {offsets = [0, 4, 0], sizes = [8, 1, 256], strides = [1, 1, 1]} : vector<8x8x256xf32> to vector<8x1x256xf32>
    %8 = vector.extract_strided_slice %4 {offsets = [0, 5, 0], sizes = [8, 1, 256], strides = [1, 1, 1]} : vector<8x8x256xf32> to vector<8x1x256xf32>
    %9 = vector.extract_strided_slice %4 {offsets = [0, 6, 0], sizes = [8, 1, 256], strides = [1, 1, 1]} : vector<8x8x256xf32> to vector<8x1x256xf32>
    %10 = vector.extract_strided_slice %4 {offsets = [0, 7, 0], sizes = [8, 1, 256], strides = [1, 1, 1]} : vector<8x8x256xf32> to vector<8x1x256xf32>
    %11 = arith.fptosi %10 : vector<8x1x256xf32> to vector<8x1x256xi32>
    %12 = vector.extract_strided_slice %3 {offsets = [0, 0, 0], sizes = [8, 5, 256], strides = [1, 1, 1]} : vector<8x9x256xf32> to vector<8x5x256xf32>
    %cst = arith.constant 0.000000e+00 : f32
    %13 = vector.broadcast %cst : f32 to vector<8x5x256xf32>
    %14 = arith.subf %13, %12 : vector<8x5x256xf32>
    %15 = math.exp %14 : vector<8x5x256xf32>
    %cst_6 = arith.constant 1.000000e+00 : f32
    %16 = vector.broadcast %cst_6 : f32 to vector<8x5x256xf32>
    %17 = arith.addf %16, %15 : vector<8x5x256xf32>
    %18 = tpu.reciprocal %17 {approx = true} : vector<8x5x256xf32> -> vector<8x5x256xf32>
    %19 = vector.extract_strided_slice %18 {offsets = [0, 0, 0], sizes = [8, 2, 256], strides = [1, 1, 1]} : vector<8x5x256xf32> to vector<8x2x256xf32>
    %20 = vector.extract_strided_slice %18 {offsets = [0, 4, 0], sizes = [8, 1, 256], strides = [1, 1, 1]} : vector<8x5x256xf32> to vector<8x1x256xf32>
    %21 = vector.extract_strided_slice %3 {offsets = [0, 2, 0], sizes = [8, 2, 256], strides = [1, 1, 1]} : vector<8x9x256xf32> to vector<8x2x256xf32>
    %22 = vector.extract_strided_slice %3 {offsets = [0, 5, 0], sizes = [8, 4, 256], strides = [1, 1, 1]} : vector<8x9x256xf32> to vector<8x4x256xf32>
    %23 = arith.subf %19, %5 : vector<8x2x256xf32>
    %24 = arith.mulf %23, %23 : vector<8x2x256xf32>
    %25 = arith.subf %21, %6 : vector<8x2x256xf32>
    %26 = arith.mulf %25, %25 : vector<8x2x256xf32>
    %27 = arith.addf %24, %26 : vector<8x2x256xf32>
    %cst_7 = arith.constant dense<0.000000e+00> : vector<8x256xf32>
    %28 = vector.multi_reduction <add>, %27, %cst_7 [1] : vector<8x2x256xf32> to vector<8x256xf32>
    %29 = vector.shape_cast %28 : vector<8x256xf32> to vector<8x1x256xf32>
    %30 = arith.mulf %7, %29 : vector<8x1x256xf32>
    %31 = arith.subf %20, %8 : vector<8x1x256xf32>
    %32 = arith.mulf %31, %31 : vector<8x1x256xf32>
    %33 = arith.mulf %9, %32 : vector<8x1x256xf32>
    %cst_8 = arith.constant dense<0xFF800000> : vector<8x256xf32>
    %34 = vector.multi_reduction <maximumf>, %22, %cst_8 [1] : vector<8x4x256xf32> to vector<8x256xf32>
    %35 = vector.shape_cast %34 : vector<8x256xf32> to vector<8x1x256xf32>
    %36 = vector.broadcast %35 : vector<8x1x256xf32> to vector<8x4x256xf32>
    %37 = arith.subf %22, %36 : vector<8x4x256xf32>
    %38 = math.exp %37 : vector<8x4x256xf32>
    %cst_9 = arith.constant dense<0.000000e+00> : vector<8x256xf32>
    %39 = vector.multi_reduction <add>, %38, %cst_9 [1] : vector<8x4x256xf32> to vector<8x256xf32>
    %40 = vector.shape_cast %39 : vector<8x256xf32> to vector<8x1x256xf32>
    %41 = math.log %40 : vector<8x1x256xf32>
    %42 = arith.addf %35, %41 : vector<8x1x256xf32>
    %43 = tpu.iota {dimensions = array<i32: 1>} : vector<8x4x256xi32>
    %44 = vector.broadcast %11 : vector<8x1x256xi32> to vector<8x4x256xi32>
    %45 = arith.cmpi eq, %43, %44 : vector<8x4x256xi32>
    %cst_10 = arith.constant 0.000000e+00 : f32
    %46 = vector.broadcast %cst_10 : f32 to vector<8x4x256xf32>
    %47 = arith.select %45, %22, %46 : vector<8x4x256xi1>, vector<8x4x256xf32>
    %cst_11 = arith.constant dense<0.000000e+00> : vector<8x256xf32>
    %48 = vector.multi_reduction <add>, %47, %cst_11 [1] : vector<8x4x256xf32> to vector<8x256xf32>
    %49 = vector.shape_cast %48 : vector<8x256xf32> to vector<8x1x256xf32>
    %cst_12 = arith.constant 1.000000e+00 : f32
    %50 = vector.broadcast %cst_12 : f32 to vector<8x1x256xf32>
    %51 = arith.mulf %50, %8 : vector<8x1x256xf32>
    %52 = arith.subf %42, %49 : vector<8x1x256xf32>
    %53 = arith.mulf %51, %52 : vector<8x1x256xf32>
    %54 = arith.addf %30, %33 : vector<8x1x256xf32>
    %55 = arith.addf %54, %53 : vector<8x1x256xf32>
    %56 = vector.extract_strided_slice %55 {offsets = [0, 0, 0], sizes = [8, 1, 128], strides = [1, 1, 1]} : vector<8x1x256xf32> to vector<8x1x128xf32>
    %57 = vector.extract_strided_slice %55 {offsets = [0, 0, 128], sizes = [8, 1, 128], strides = [1, 1, 1]} : vector<8x1x256xf32> to vector<8x1x128xf32>
    %58 = arith.addf %56, %57 : vector<8x1x128xf32>
    %c0_13 = arith.constant 0 : index
    %c0_14 = arith.constant 0 : index
    %c0_15 = arith.constant 0 : index
    %59 = vector.load %arg4[%c0_13, %c0_14, %c0_15] : memref<8x1x128xf32, #tpu.memory_space<vmem>>, vector<8x1x128xf32>
    %60 = arith.addf %59, %58 : vector<8x1x128xf32>
    %c0_16 = arith.constant 0 : index
    %c0_17 = arith.constant 0 : index
    %c0_18 = arith.constant 0 : index
    %61 = vector.load %arg4[%c0_16, %c0_17, %c0_18] : memref<8x1x128xf32, #tpu.memory_space<vmem>>, vector<8x1x128xf32>
    tpu.vector_store %arg4[%c0_16, %c0_17, %c0_18], %60 {strides = array<i32>} : memref<8x1x128xf32, #tpu.memory_space<vmem>>, vector<8x1x128xf32>,
    return
  }
  func.func @transform_0(%arg0: i32, %arg1: i32) -> (i32, i32, i32) {
    %c0_i32 = arith.constant 0 : i32
    %c0_i32_0 = arith.constant 0 : i32
    return %arg0, %c0_i32, %arg1 : i32, i32, i32
  }
  func.func @transform_1(%arg0: i32, %arg1: i32) -> (i32, i32, i32) {
    %c0_i32 = arith.constant 0 : i32
    %c0_i32_0 = arith.constant 0 : i32
    return %arg0, %c0_i32, %arg1 : i32, i32, i32
  }
  func.func @transform_2(%arg0: i32, %arg1: i32) -> (i32, i32, i32) {
    %c0_i32 = arith.constant 0 : i32
    %c0_i32_0 = arith.constant 0 : i32
    %c0_i32_1 = arith.constant 0 : i32
    return %arg0, %c0_i32, %c0_i32_0 : i32, i32, i32
  }
}

</mosaic_0001>

<bundles_post_ra>
// kernel: _criterion_fn.1
= control target key start
LH: loop header
LB: loop body
LE: loop exit
PB: predicated region body
PF: predicated region fallthrough
CT: control target
= control target key end

     0   :  { %s2300_s9 = smov 0   ;;  %s2302_s10 = smov 0   ;;  %s3783_s0 = inlined_call_operand.vmem [shape: f32[16,9,256], index: 0, kind: input, shape index: {}]   ;;  %s3784_s1 = inlined_call_operand.vmem [shape: f32[16,8,256], index: 1, kind: input, shape index: {}]   ;;  %s3785_s2 = inlined_call_operand.vmem [shape: f32[16,1,128], index: 2, kind: output, shape index: {}]  }
   0x1   :  { %s2304_s11 = smov 0  }
   0x2 LB: > { %s24_s12 = sadd.s32 1, %s2277_s10  ;;  %p1995_p0 = scmp.ge.s32.totalorder %s2281_s11, 1  ;;  %s2281_s11 = sphi %s2304_s11, %s12_s11   ;;  %s2277_s10 = sphi %s2302_s10, %s4134_s10   ;;  %s2273_s9 = sphi %s2300_s9, %s4133_s9  }
   0x3   : > { %p26_p1 = scmp.ge.s32.totalorder %s24_s12, 2  ;;  %p152_p2 = scmp.lt.s32.totalorder %s2281_s11, 3 }
   0x5   : > { %s4136_s12 = smov (%p26_p1, %s24_s12), 0  ;;  %p153_p3 = pnand %p1995_p0, %p152_p2 }
   0x7   : > { %156 = sbr.rel (%p153_p3) target bundleno = 342 (0x156), region = 28 }
   0xc   : > { %s1996_s13 = sshll.u32 %s2273_s9, 3  ;;  %v2283_v0 = vmov 0.0   ;;  %vm501_vm0 = vcmask 1041408   ;;  %vm774_vm1 = vcmask 1047557   ;;  %vm776_vm2 = vcmask 1040384  }
   0xd   : > { %p190_p4 = scmp.lt.s32.totalorder %s1996_s13, 15  ;;  %vm3842_vm3 = vcmask 1042432   ;;  %vm3841_vm4 = vcmask 1043456  }
   0xf   : > { %s4138_s13 = smov (!%p190_p4, %s1996_s13), 15 }
  0x10   : > { %s2321_s16 = scalar_lea.vmem %s3785_s2, %s4138_s13  ;;  %s2005_s17 = sshll.u32 %s4138_s13, 5 }
  0x11   : > { %221 = vst [vmem:[%s2321_s16] sm:$0x1] %v2283_v0  ;;  %222 = vst [vmem:[%s2321_s16 + $0x1] sm:$0x1] %v2283_v0  ;;  %s2334_s20 = scalar_lea.vmem %s3783_s0, %s2005_s17  ;;  %s2006_s21 = sshll.u32 %s4138_s13, 4 }
  0x12   : > { %223 = vst [vmem:[%s2321_s16 + $0x2] sm:$0x1] %v2283_v0  ;;  %224 = vst [vmem:[%s2321_s16 + $0x3] sm:$0x1] %v2283_v0  ;;  %s2339_s24 = scalar_lea.vmem %s3784_s1, %s2006_s21  ;;  %v2342_v1 = vld [vmem:[%s2334_s20] sm:$0xff]  ;;  %v2345_v2 = vld [vmem:[%s2334_s20 + $0x8] sm:$0xff] }
  0x13   : > { %225 = vst [vmem:[%s2321_s16 + $0x4] sm:$0x1] %v2283_v0  ;;  %226 = vst [vmem:[%s2321_s16 + $0x5] sm:$0x1] %v2283_v0  ;;  %v2348_v3 = vld [vmem:[%s2334_s20 + $0x20] sm:$0xff]  ;;  %v2351_v4 = vld [vmem:[%s2334_s20 + $0x28] sm:$0xff] }
  0x14   : > { %227 = vst [vmem:[%s2321_s16 + $0x6] sm:$0x1] %v2283_v0  ;;  %228 = vst [vmem:[%s2321_s16 + $0x7] sm:$0x1] %v2283_v0  ;;  %v2354_v5 = vld [vmem:[%s2334_s20 + $0x40] sm:$0xff]  ;;  %v2357_v6 = vld [vmem:[%s2334_s20 + $0x48] sm:$0xff] }
  0x15   : > { %3845 = vst [vmem:[#allocation2_spill] sm:$0xff] %v2342_v1  ;;  %3846 = vst [vmem:[#allocation3_spill] sm:$0xff] %v2345_v2  ;;  %v2360_v7 = vld [vmem:[%s2334_s20 + $0x60] sm:$0xff]  ;;  %v2363_v8 = vld [vmem:[%s2334_s20 + $0x68] sm:$0xff]  ;;  %v293_v14 = vsub.f32 0.0, %v2342_v1  ;;  %v294_v15 = vsub.f32 0.0, %v2345_v2 }
  0x16   : > { %3847 = vst [vmem:[#allocation4_spill] sm:$0xff] %v2348_v3  ;;  %3848 = vst [vmem:[#allocation5_spill] sm:$0xff] %v2351_v4  ;;  %v2366_v9 = vld [vmem:[%s2334_s20 + $0x80] sm:$0xff]  ;;  %v2369_v10 = vld [vmem:[%s2334_s20 + $0x88] sm:$0xff]  ;;  %v295_v19 = vsub.f32 0.0, %v2348_v3  ;;  %v296_v20 = vsub.f32 0.0, %v2351_v4 }
  0x17   : > { %3849 = vst [vmem:[#allocation6_spill] sm:$0xff] %v2354_v5  ;;  %3850 = vst [vmem:[#allocation7_spill] sm:$0xff] %v2357_v6  ;;  %v2372_v11 = vld [vmem:[%s2334_s20 + $0xa0] sm:$0xff]  ;;  %v2375_v12 = vld [vmem:[%s2334_s20 + $0xa8] sm:$0xff]  ;;  %v297_v21 = vsub.f32 0.0, %v2354_v5  ;;  %v298_v25 = vsub.f32 0.0, %v2357_v6 }
  0x18   : > { %3851 = vst [vmem:[#allocation8_spill] sm:$0xff] %v2360_v7  ;;  %3852 = vst [vmem:[#allocation9_spill] sm:$0xff] %v2363_v8  ;;  %v2378_v13 = vld [vmem:[%s2339_s24] sm:$0xff]  ;;  %v2383_v16 = vld [vmem:[%s2339_s24 + $0x8] sm:$0xff]  ;;  %v299_v26 = vsub.f32 0.0, %v2360_v7  ;;  %v300_v27 = vsub.f32 0.0, %v2363_v8 }
  0x19   : > { %v2386_v17 = vld [vmem:[%s2339_s24 + $0x10] sm:$0xff]  ;;  %v2389_v18 = vld [vmem:[%s2339_s24 + $0x18] sm:$0xff]  ;;  %v2395_v22 = vld [vmem:[%s2339_s24 + $0x20] sm:$0xff]  ;;  %v301_v28 = vsub.f32 0.0, %v2366_v9  ;;  %v302_v29 = vsub.f32 0.0, %v2369_v10  ;;  %v2007_v33 = vtrunc.f32 %v2378_v13  ;;  %v2009_v34 = vtrunc.f32 %v2383_v16 }
  0x1a   : > { %v2398_v23 = vld [vmem:[%s2339_s24 + $0x28] sm:$0xff]  ;;  %v2401_v24 = vld [vmem:[%s2339_s24 + $0x30] sm:$0xff]  ;;  %v2411_v32 = vld [vmem:[%s2339_s24 + $0x38] sm:$0xff]  ;;  %v2011_v35 = vtrunc.f32 %v2386_v17  ;;  %v2013_v36 = vtrunc.f32 %v2389_v18  ;;  %v2015_v39 = vtrunc.f32 %v2395_v22  ;;  %v309_v42 = vmul.f32 1.442695, %v293_v14 }
  0x1b   : > { %3853 = vst [vmem:[#allocation10_spill] sm:$0xff] %v2398_v23  ;;  %3854 = vst [vmem:[#allocation11_spill] sm:$0xff] %v2401_v24  ;;  %v2418_v37 = vld [vmem:[%s2334_s20 + $0xc0] sm:$0xff]  ;;  %v2421_v38 = vld [vmem:[%s2334_s20 + $0xc8] sm:$0xff]  ;;  %v2017_v40 = vtrunc.f32 %v2398_v23  ;;  %v2019_v41 = vtrunc.f32 %v2401_v24  ;;  %v311_v47 = vmul.f32 1.442695, %v294_v15  ;;  %v2021_v49 = vtrunc.f32 %v2411_v32 }
  0x1c   : > { %3855 = vst [vmem:[#allocation12_spill] sm:$0xff] %v2411_v32  ;;  %v2427_v43 = vld [vmem:[%s2334_s20 + $0xe0] sm:$0xff]  ;;  %v2430_v44 = vld [vmem:[%s2334_s20 + $0xe8] sm:$0xff]  ;;  %v305_v45 = vsub.f32 0.0, %v2418_v37  ;;  %v306_v46 = vsub.f32 0.0, %v2421_v38  ;;  %v2442_v52 = vsub.f32 %v2342_v1, %v2378_v13  ;;  %v2447_v54 = vcvt.f32.s32 %v2007_v33  ;;  %v2456_v58 = vld [vmem:[%s2339_s24 + $0x50] sm:$0xff] }
  0x1d   : > { %v2435_v48 = vld [vmem:[%s2339_s24 + $0x40] sm:$0xff]  ;;  %v307_v50 = vsub.f32 0.0, %v2427_v43  ;;  %v308_v51 = vsub.f32 0.0, %v2430_v44  ;;  %v2445_v53 = vld [vmem:[%s2339_s24 + $0x48] sm:$0xff]  ;;  %v2449_v55 = vcvt.f32.s32 %v2009_v34  ;;  %v2451_v56 = vcvt.f32.s32 %v2011_v35  ;;  %v2459_v59 = vld [vmem:[%s2339_s24 + $0x58] sm:$0xff] }
  0x1e   : > { %3856 = vst [vmem:[#allocation13_spill] sm:$0xff] %v2435_v48  ;;  %3857 = vst [vmem:[#allocation14_spill] sm:$0xff] %v2447_v54  ;;  %v2453_v57 = vcvt.f32.s32 %v2013_v36  ;;  %v2461_v60 = vcvt.f32.s32 %v2015_v39  ;;  %v2463_v61 = vcvt.f32.s32 %v2017_v40  ;;  %v2465_v62 = vcvt.f32.s32 %v2019_v41  ;;  %v2468_v63 = vld [vmem:[%s2339_s24 + $0x60] sm:$0xff]  ;;  %v2471_v0 = vld [vmem:[%s2339_s24 + $0x68] sm:$0xff] }
  0x1f   : > { %3858 = vst [vmem:[#allocation15_spill] sm:$0xff] %v2449_v55  ;;  %3859 = vst [vmem:[#allocation16_spill] sm:$0xff] %v2451_v56  ;;  %2065 = vpow2.f32 %v309_v42  ;;  %v2023_v14 = vtrunc.f32 %v2435_v48  ;;  %v313_v15 = vmul.f32 1.442695, %v295_v19  ;;  %v315_v33 = vmul.f32 1.442695, %v296_v20 }
  0x20   : > { %3860 = vst [vmem:[#allocation17_spill] sm:$0xff] %v2453_v57  ;;  %3861 = vst [vmem:[#allocation18_spill] sm:$0xff] %v2461_v60  ;;  %2067 = vpow2.f32 %v311_v47  ;;  %v2475_v34 = vld [vmem:[%s2339_s24 + $0x70] sm:$0xff]  ;;  %v2478_v35 = vld [vmem:[%s2339_s24 + $0x78] sm:$0xff]  ;;  %v2480_v36 = vcvt.f32.s32 %v2021_v49  ;;  %v2025_v39 = vtrunc.f32 %v2445_v53  ;;  %v317_v40 = vmul.f32 1.442695, %v297_v21 }
  0x21   : > { %3862 = vst [vmem:[#allocation19_spill] sm:$0xff] %v2463_v61  ;;  %3863 = vst [vmem:[#allocation20_spill] sm:$0xff] %v2465_v62  ;;  %v319_v41 = vmul.f32 1.442695, %v298_v25  ;;  %v2027_v42 = vtrunc.f32 %v2456_v58  ;;  %v2029_v31 = vtrunc.f32 %v2459_v59  ;;  %2069 = vpow2.f32 %v313_v15 }
  0x22   : > { %3864 = vst [vmem:[#allocation21_spill] sm:$0xff] %v2480_v36  ;;  %v321_v30 = vmul.f32 1.442695, %v299_v26  ;;  %v2031_v47 = vtrunc.f32 %v2468_v63  ;;  %v2033_v19 = vtrunc.f32 %v2471_v0  ;;  %2071 = vpow2.f32 %v315_v33 }
  0x23   : > { %v323_v20 = vmul.f32 1.442695, %v300_v27  ;;  %v2035_v62 = vtrunc.f32 %v2475_v34  ;;  %v2037_v49 = vtrunc.f32 %v2478_v35  ;;  %2073 = vpow2.f32 %v317_v40 }
  0x24   : > { %v325_v36 = vmul.f32 1.442695, %v301_v28  ;;  %v2489_v21 = vcvt.f32.s32 %v2023_v14  ;;  %v2491_v25 = vcvt.f32.s32 %v2025_v39  ;;  %2075 = vpow2.f32 %v319_v41 }
  0x25   : > { %v327_v61 = vmul.f32 1.442695, %v302_v29  ;;  %v2493_v15 = vcvt.f32.s32 %v2027_v42  ;;  %v2495_v26 = vcvt.f32.s32 %v2029_v31  ;;  %2077 = vpow2.f32 %v321_v30 }
  0x26   : > { %3865 = vst [vmem:[#allocation22_spill] sm:$0xff] %v2489_v21  ;;  %3866 = vst [vmem:[#allocation23_spill] sm:$0xff] %v2491_v25  ;;  %v3869_v33 = vsub.f32 0.0, %v2372_v11  ;;  %v2499_v60 = vcvt.f32.s32 %v2031_v47  ;;  %v2501_v57 = vcvt.f32.s32 %v2033_v19  ;;  %2079 = vpow2.f32 %v323_v20 }
  0x27   : > { %3867 = vst [vmem:[#allocation24_spill] sm:$0xff] %v2493_v15  ;;  %3868 = vst [vmem:[#allocation25_spill] sm:$0xff] %v2495_v26  ;;  %v3872_v28 = vsub.f32 0.0, %v2375_v12  ;;  %v2505_v39 = vcvt.f32.s32 %v2035_v62  ;;  %v2507_v40 = vcvt.f32.s32 %v2037_v49  ;;  %2081 = vpow2.f32 %v325_v36 }
  0x28   : > { %v329_v27 = vmul.f32 1.442695, %v3869_v33  ;;  %3870 = vst [vmem:[#allocation26_spill] sm:$0xff] %v2499_v60  ;;  %3871 = vst [vmem:[#allocation27_spill] sm:$0xff] %v2501_v57  ;;  %v333_v29 = vmul.f32 1.442695, %v305_v45  ;;  %2083 = vpow2.f32 %v327_v61  ;;  %v406_v41 = vsub.f32 %v2345_v2, %v2383_v16 }
  0x29   : > { %v331_v14 = vmul.f32 1.442695, %v3872_v28  ;;  %3873 = vst [vmem:[#allocation28_spill] sm:$0xff] %v2505_v39  ;;  %3874 = vst [vmem:[#allocation29_spill] sm:$0xff] %v2507_v40  ;;  %v335_v31 = vmul.f32 1.442695, %v306_v46  ;;  %v407_v47 = vsub.f32 %v2348_v3, %v2386_v17  ;;  %v408_v19 = vsub.f32 %v2351_v4, %v2389_v18 }
  0x2a   : > { %v337_v30 = vmul.f32 1.442695, %v307_v50  ;;  %2085 = vpow2.f32 %v329_v27  ;;  %v339_v42 = vmul.f32 1.442695, %v308_v51  ;;  %v409_v62 = vsub.f32 %v2354_v5, %v2395_v22 }
  0x2b   : > { %2087 = vpow2.f32 %v331_v14  ;;  %v410_v45 = vsub.f32 %v2357_v6, %v2398_v23  ;;  %v411_v46 = vsub.f32 %v2360_v7, %v2401_v24  ;;  %v412_v51 = vsub.f32 %v2363_v8, %v2411_v32 }
  0x2c   : > { %v2066_v50 = vpop.eup %2065  ;;  %2089 = vpow2.f32 %v333_v29  ;;  %v413_v61 = vsub.f32 %v2366_v9, %v2435_v48  ;;  %v414_v36 = vsub.f32 %v2369_v10, %v2445_v53  ;;  %v415_v33 = vsub.f32 %v2372_v11, %v2456_v58 }
  0x2d   : > { %v2068_v20 = vpop.eup %2067  ;;  %2091 = vpow2.f32 %v335_v31  ;;  %v341_v49 = vadd.f32 1.0, %v2066_v50  ;;  %v416_v27 = vsub.f32 %v2375_v12, %v2459_v59  ;;  %v417_v14 = vsub.f32 %v2418_v37, %v2468_v63 }
  0x2e   : > { %2093 = vpow2.f32 %v337_v30  ;;  %v342_v28 = vadd.f32 1.0, %v2068_v20  ;;  %v418_v9 = vsub.f32 %v2421_v38, %v2471_v0  ;;  %v2070_v29 = vpop.eup %2069  ;;  %v419_v10 = vsub.f32 %v2427_v43, %v2475_v34 }
  0x2f   : > { %2095 = vpow2.f32 %v339_v42  ;;  %v420_v31 = vsub.f32 %v2430_v44, %v2478_v35  ;;  %v2541_v11 = vmul.f32 %v2442_v52, %v2442_v52  ;;  %v2072_v12 = vpop.eup %2071  ;;  %v343_v30 = vadd.f32 1.0, %v2070_v29 }
  0x30   : > { %2097 = vrcp.f32 %v341_v49  ;;  %v2543_v50 = vmul.f32 %v406_v41, %v406_v41  ;;  %v2545_v37 = vmul.f32 %v407_v47, %v407_v47  ;;  %v2074_v38 = vpop.eup %2073  ;;  %v344_v20 = vadd.f32 1.0, %v2072_v12 }
  0x31   : > { %2099 = vrcp.f32 %v342_v28  ;;  %v2547_v42 = vmul.f32 %v408_v19, %v408_v19  ;;  %v2549_v43 = vmul.f32 %v409_v62, %v409_v62  ;;  %v2076_v40 = vpop.eup %2075  ;;  %v345_v44 = vadd.f32 1.0, %v2074_v38 }
  0x32   : > { %2101 = vrcp.f32 %v343_v30  ;;  %v2551_v39 = vmul.f32 %v410_v45, %v410_v45  ;;  %v2553_v52 = vmul.f32 %v411_v46, %v411_v46  ;;  %v2078_v29 = vpop.eup %2077  ;;  %v346_v49 = vadd.f32 1.0, %v2076_v40 }
  0x33   : > { %2103 = vrcp.f32 %v344_v20  ;;  %v2555_v41 = vmul.f32 %v412_v51, %v412_v51  ;;  %v2557_v47 = vmul.f32 %v413_v61, %v413_v61  ;;  %v2080_v12 = vpop.eup %2079  ;;  %v347_v28 = vadd.f32 1.0, %v2078_v29 }
  0x34   : > { %2105 = vrcp.f32 %v345_v44  ;;  %v2559_v19 = vmul.f32 %v414_v36, %v414_v36  ;;  %v2561_v62 = vmul.f32 %v415_v33, %v415_v33  ;;  %v2082_v38 = vpop.eup %2081  ;;  %v348_v30 = vadd.f32 1.0, %v2080_v12 }
  0x35   : > { %2107 = vrcp.f32 %v346_v49  ;;  %v2563_v45 = vmul.f32 %v416_v27, %v416_v27  ;;  %v2565_v46 = vmul.f32 %v417_v14, %v417_v14  ;;  %v2084_v40 = vpop.eup %2083  ;;  %v349_v20 = vadd.f32 1.0, %v2082_v38 }
  0x36   : > { %2109 = vrcp.f32 %v347_v28  ;;  %v2567_v51 = vmul.f32 %v418_v9, %v418_v9  ;;  %v2569_v61 = vmul.f32 %v419_v10, %v419_v10  ;;  %v350_v44 = vadd.f32 1.0, %v2084_v40 }
  0x37   : > { %v2086_v29 = vpop.eup %2085  ;;  %2111 = vrcp.f32 %v348_v30  ;;  %v2571_v36 = vmul.f32 %v420_v31, %v420_v31  ;;  %v453_v33 = vrot.slane %v2541_v11, 2  ;;  %v454_v27 = vrot.slane %v2543_v50, 2 }
  0x38   : > { %v2088_v12 = vpop.eup %2087  ;;  %v351_v49 = vadd.f32 1.0, %v2086_v29  ;;  %2113 = vrcp.f32 %v349_v20  ;;  %v649_v50 = vrot.slane %v2389_v18, 1  ;;  %v651_v26 = vrot.slane %v2398_v23, 1 }
  0x39   : > { %v2090_v38 = vpop.eup %2089  ;;  %v352_v28 = vadd.f32 1.0, %v2088_v12  ;;  %2115 = vrcp.f32 %v350_v44 }
  0x3a   : > { %v2092_v30 = vpop.eup %2091  ;;  %v353_v31 = vadd.f32 1.0, %v2090_v38  ;;  %2117 = vrcp.f32 %v351_v49  ;;  %v647_v49 = vrot.slane %v2383_v16, 1 }
  0x3b   : > { %v2094_v20 = vpop.eup %2093  ;;  %v354_v29 = vadd.f32 1.0, %v2092_v30  ;;  %2119 = vrcp.f32 %v352_v28  ;;  %v648_v28 = vrot.slane %v2386_v17, 1 }
  0x3c   : > { %v2096_v12 = vpop.eup %2095  ;;  %v355_v9 = vadd.f32 1.0, %v2094_v20  ;;  %2121 = vrcp.f32 %v353_v31  ;;  %v646_v20 = vrot.slane %v2378_v13, 1 }
  0x3d   : > { %v2098_v38 = vpop.eup %2097  ;;  %v356_v14 = vadd.f32 1.0, %v2096_v12  ;;  %2123 = vrcp.f32 %v354_v29  ;;  %v650_v12 = vrot.slane %v2395_v22, 1 }
  0x3e   : > { %v2100_v11 = vpop.eup %2099  ;;  %v373_v44 = vsub.f32 %v2098_v38, %v2378_v13  ;;  %2125 = vrcp.f32 %v355_v9  ;;  %v678_v2 = vsub.f32 %v2098_v38, %v646_v20 }
  0x3f   : > { %v2102_v10 = vpop.eup %2101  ;;  %v374_v57 = vsub.f32 %v2100_v11, %v2383_v16  ;;  %2127 = vrcp.f32 %v356_v14 }
  0x40   : > { %v2104_v40 = vpop.eup %2103  ;;  %v389_v30 = vmul.f32 %v373_v44, %v373_v44  ;;  %v375_v21 = vsub.f32 %v2102_v10, %v2386_v17 }
  0x41   : > { %v2106_v31 = vpop.eup %2105  ;;  %v390_v60 = vmul.f32 %v374_v57, %v374_v57  ;;  %v376_v29 = vsub.f32 %v2104_v40, %v2389_v18  ;;  %v2641_v38 = vsub.f32 %v2104_v40, %v649_v50  ;;  %v3889_v40 = vrot.slane %v2553_v52, 2 }
  0x42   : > { %v2108_v25 = vpop.eup %2107  ;;  %v485_v56 = vadd.f32 %v453_v33, %v389_v30  ;;  %v377_v14 = vsub.f32 %v2106_v31, %v2395_v22  ;;  %v391_v6 = vmul.f32 %v375_v21, %v375_v21  ;;  %v2633_v33 = vsub.f32 %v2102_v10, %v648_v28 }
  0x43   : > { %v2601_v44 = vpop.eup %2109  ;;  %v486_v55 = vadd.f32 %v454_v27, %v390_v60  ;;  %v378_v60 = vsub.f32 %v2108_v25, %v2398_v23  ;;  %v392_v1 = vmul.f32 %v376_v29, %v376_v29  ;;  %3882 = vst [vmem:[#allocation36_spill] sm:$0xff] %v2641_v38  ;;  %v2647_v29 = vmul.f32 %v678_v2, %v678_v2 }
  0x44   : > { %3875 = vst [vmem:[#allocation30_spill] sm:$0xff] %v2601_v44  ;;  %v2606_v7 = vpop.eup %2111  ;;  %v502_v15 = vsel %vm501_vm0, %v485_v56, 0.0  ;;  %v379_v27 = vsub.f32 %v2601_v44, %v2401_v24  ;;  %v393_v44 = vmul.f32 %v377_v14, %v377_v14  ;;  %3880 = vst [vmem:[#allocation35_spill] sm:$0xff] %v2633_v33  ;;  %v3885_v28 = vrot.slane %v2547_v42, 2 }
  0x45   : > { %3876 = vst [vmem:[#allocation31_spill] sm:$0xff] %v2606_v7  ;;  %v2612_v30 = vpop.eup %2113  ;;  %v503_v57 = vrot.slane %v502_v15, 4  ;;  %v380_v9 = vsub.f32 %v2606_v7, %v2411_v32  ;;  %v509_v56 = vsel %vm501_vm0, %v486_v55, 0.0  ;;  %v2631_v7 = vsub.f32 %v2100_v11, %v647_v49  ;;  %3884 = vst [vmem:[#allocation38_spill] sm:$0xff] %v2647_v29 }
  0x46   : > { %3877 = vst [vmem:[#allocation32_spill] sm:$0xff] %v2612_v30  ;;  %v2618_v54 = vpop.eup %2115  ;;  %v381_v4 = vsub.f32 %v2612_v30, %v2435_v48  ;;  %v394_v21 = vmul.f32 %v378_v60, %v378_v60  ;;  %v395_v55 = vmul.f32 %v379_v27, %v379_v27  ;;  %v510_v32 = vrot.slane %v509_v56, 4 }
  0x47   : > { %3878 = vst [vmem:[#allocation33_spill] sm:$0xff] %v2618_v54  ;;  %v2624_v5 = vpop.eup %2117  ;;  %v382_v3 = vsub.f32 %v2618_v54, %v2445_v53  ;;  %v504_v24 = vadd.f32 %v503_v57, %v502_v15  ;;  %3879 = vst [vmem:[#allocation34_spill] sm:$0xff] %v2631_v7  ;;  %v396_v48 = vmul.f32 %v380_v9, %v380_v9  ;;  %v3881_v54 = vrot.slane %v2545_v37, 2 }
  0x48   : > { %v2635_v23 = vpop.eup %2119  ;;  %v383_v30 = vsub.f32 %v2624_v5, %v2456_v58  ;;  %v397_v15 = vmul.f32 %v381_v4, %v381_v4  ;;  %v2645_v49 = vsub.f32 %v2106_v31, %v650_v12  ;;  %v488_v57 = vadd.f32 %v3885_v28, %v392_v1 }
  0x49   : > { %v487_v8 = vadd.f32 %v3881_v54, %v391_v6  ;;  %v2643_v20 = vpop.eup %2121  ;;  %v398_v11 = vmul.f32 %v382_v3, %v382_v3  ;;  %v3886_v9 = vrot.slane %v2549_v43, 2  ;;  %v505_v37 = vrot.slane %v504_v24, 2 }
  0x4a   : > { %3883 = vst [vmem:[#allocation37_spill] sm:$0xff] %v2645_v49  ;;  %v2649_v10 = vpop.eup %2123  ;;  %v2655_v6 = vsub.f32 %v2108_v25, %v651_v26  ;;  %v384_v3 = vsub.f32 %v2635_v23, %v2459_v59  ;;  %v3888_v4 = vrot.slane %v2551_v39, 2  ;;  %v491_v50 = vadd.f32 %v3889_v40, %v395_v55 }
  0x4b   : > { %v489_v14 = vadd.f32 %v3886_v9, %v393_v44  ;;  %v2657_v54 = vpop.eup %2125  ;;  %v511_v12 = vadd.f32 %v510_v32, %v509_v56  ;;  %v385_v1 = vsub.f32 %v2643_v20, %v2468_v63  ;;  %v399_v42 = vmul.f32 %v383_v30, %v383_v30 }
  0x4c   : > { %3887 = vst [vmem:[#allocation39_spill] sm:$0xff] %v2655_v6  ;;  %v490_v2 = vadd.f32 %v3888_v4, %v394_v21  ;;  %v3890_v43 = vrot.slane %v2555_v41, 2  ;;  %v516_v26 = vsel %vm501_vm0, %v487_v8, 0.0  ;;  %v2670_v31 = vpop.eup %2127  ;;  %v386_v44 = vsub.f32 %v2649_v10, %v2471_v0 }
  0x4d   : > { %3891 = vst [vmem:[#allocation40_spill] sm:$0xff] %v2670_v31  ;;  %v3892_v39 = vrot.slane %v2557_v47, 2  ;;  %v3893_v52 = vrot.slane %v2559_v19, 2  ;;  %v517_v27 = vrot.slane %v516_v26, 4  ;;  %v387_v30 = vsub.f32 %v2657_v54, %v2475_v34 }
  0x4e   : > { %v492_v25 = vadd.f32 %v3890_v43, %v396_v48  ;;  %v506_v56 = vadd.f32 %v505_v37, %v504_v24  ;;  %v523_v48 = vsel %vm501_vm0, %v488_v57, 0.0  ;;  %v530_v8 = vsel %vm501_vm0, %v489_v14, 0.0 }
  0x4f   : > { %v493_v60 = vadd.f32 %v3892_v39, %v397_v15  ;;  %v494_v32 = vadd.f32 %v3893_v52, %v398_v11  ;;  %v512_v41 = vrot.slane %v511_v12, 2  ;;  %v518_v21 = vadd.f32 %v517_v27, %v516_v26 }
  0x50   : > { %v524_v55 = vrot.slane %v523_v48, 4  ;;  %v531_v28 = vrot.slane %v530_v8, 4  ;;  %v388_v47 = vsub.f32 %v2670_v31, %v2478_v35  ;;  %v537_v15 = vsel %vm501_vm0, %v490_v2, 0.0 }
  0x51   : > { %v544_v19 = vsel %vm501_vm0, %v491_v50, 0.0  ;;  %v551_v11 = vsel %vm501_vm0, %v492_v25, 0.0  ;;  %v519_v9 = vrot.slane %v518_v21, 2  ;;  %v538_v37 = vrot.slane %v537_v15, 4 }
  0x52   : > { %v525_v4 = vadd.f32 %v524_v55, %v523_v48  ;;  %v532_v24 = vadd.f32 %v531_v28, %v530_v8  ;;  %v545_v57 = vrot.slane %v544_v19, 4  ;;  %v552_v40 = vrot.slane %v551_v11, 4 }
  0x53   : > { %v558_v14 = vsel %vm501_vm0, %v493_v60, 0.0  ;;  %v565_v43 = vsel %vm501_vm0, %v494_v32, 0.0  ;;  %v400_v26 = vmul.f32 %v384_v3, %v384_v3  ;;  %v401_v39 = vmul.f32 %v385_v1, %v385_v1 }
  0x54   : > { %v402_v52 = vmul.f32 %v386_v44, %v386_v44  ;;  %v526_v27 = vrot.slane %v525_v4, 2  ;;  %v533_v29 = vrot.slane %v532_v24, 2  ;;  %v539_v2 = vadd.f32 %v538_v37, %v537_v15 }
  0x55   : > { %v559_v6 = vrot.slane %v558_v14, 4  ;;  %v566_v50 = vrot.slane %v565_v43, 4  ;;  %v403_v49 = vmul.f32 %v387_v30, %v387_v30  ;;  %v3894_v25 = vrot.slane %v2561_v62, 2 }
  0x56   : > { %v507_v8 = vrot.slane %v506_v56, 1  ;;  %v2691_v55 = vadd.f32 %v512_v41, %v511_v12  ;;  %v404_v28 = vmul.f32 %v388_v47, %v388_v47  ;;  %v2693_v38 = vadd.f32 %v519_v9, %v518_v21 }
  0x57   : > { %v495_v48 = vadd.f32 %v3894_v25, %v399_v42  ;;  %v546_v60 = vadd.f32 %v545_v57, %v544_v19  ;;  %v553_v32 = vadd.f32 %v552_v40, %v551_v11  ;;  %v3895_v3 = vrot.slane %v2563_v45, 2 }
  0x58   : > { %v3896_v44 = vrot.slane %v2565_v46, 2  ;;  %v3897_v37 = vrot.slane %v2567_v51, 2  ;;  %v527_v33 = vadd.f32 %v526_v27, %v525_v4  ;;  %v534_v62 = vadd.f32 %v533_v29, %v532_v24 }
  0x59   : > { %v496_v1 = vadd.f32 %v3895_v3, %v400_v26  ;;  %v540_v42 = vrot.slane %v539_v2, 2  ;;  %v560_v25 = vadd.f32 %v559_v6, %v558_v14  ;;  %v567_v12 = vadd.f32 %v566_v50, %v565_v43 }
  0x5a   : > { %v497_v15 = vadd.f32 %v3896_v44, %v401_v39  ;;  %v498_v30 = vadd.f32 %v3897_v37, %v402_v52  ;;  %v3898_v41 = vrot.slane %v2569_v61, 2  ;;  %v2703_v47 = vadd.f32 %v507_v8, %v506_v56 }
  0x5b   : > { %v514_v19 = vrot.slane %v2691_v55, 1  ;;  %v572_v45 = vsel %vm501_vm0, %v495_v48, 0.0  ;;  %v3899_v46 = vrot.slane %v2571_v36, 2  ;;  %v521_v51 = vrot.slane %v2693_v38, 1 }
  0x5c   : > { %v499_v21 = vadd.f32 %v3898_v41, %v403_v49  ;;  %v547_v9 = vrot.slane %v546_v60, 2  ;;  %v554_v4 = vrot.slane %v553_v32, 2  ;;  %v528_v29 = vrot.slane %v527_v33, 1 }
  0x5d   : > { %v500_v11 = vadd.f32 %v3899_v46, %v404_v28  ;;  %v573_v24 = vrot.slane %v572_v45, 4  ;;  %v579_v6 = vsel %vm501_vm0, %v496_v1, 0.0  ;;  %v586_v61 = vsel %vm501_vm0, %v497_v15, 0.0 }
  0x5e   : > { %v535_v49 = vrot.slane %v534_v62, 1  ;;  %v541_v56 = vadd.f32 %v540_v42, %v539_v2  ;;  %v561_v57 = vrot.slane %v560_v25, 2  ;;  %v568_v40 = vrot.slane %v567_v12, 2 }
  0x5f   : > { %v574_v14 = vadd.f32 %v573_v24, %v572_v45  ;;  %v580_v43 = vrot.slane %v579_v6, 4  ;;  %v587_v26 = vrot.slane %v586_v61, 4  ;;  %v593_v36 = vsel %vm501_vm0, %v498_v30, 0.0 }
  0x60   : > { %v548_v39 = vadd.f32 %v547_v9, %v546_v60  ;;  %v555_v52 = vadd.f32 %v554_v4, %v553_v32  ;;  %v594_v27 = vrot.slane %v593_v36, 4  ;;  %v600_v50 = vsel %vm501_vm0, %v499_v21, 0.0 }
  0x61   : > { %v575_v48 = vrot.slane %v574_v14, 2  ;;  %v581_v8 = vadd.f32 %v580_v43, %v579_v6  ;;  %v588_v28 = vadd.f32 %v587_v26, %v586_v61  ;;  %v601_v3 = vrot.slane %v600_v50, 4 }
  0x62   : > { %v562_v1 = vadd.f32 %v561_v57, %v560_v25  ;;  %v569_v44 = vadd.f32 %v568_v40, %v567_v12  ;;  %v595_v15 = vadd.f32 %v594_v27, %v593_v36  ;;  %v607_v2 = vsel %vm501_vm0, %v500_v11, 0.0 }
  0x63   : > { %v576_v37 = vadd.f32 %v575_v48, %v574_v14  ;;  %v582_v42 = vrot.slane %v581_v8, 2  ;;  %v589_v41 = vrot.slane %v588_v28, 2  ;;  %v602_v45 = vadd.f32 %v601_v3, %v600_v50 }
  0x64   : > { %v542_v46 = vrot.slane %v541_v56, 1  ;;  %v549_v30 = vrot.slane %v548_v39, 1  ;;  %v596_v60 = vrot.slane %v595_v15, 2  ;;  %v608_v32 = vrot.slane %v607_v2, 4 }
  0x65   : > { %v556_v9 = vrot.slane %v555_v52, 1  ;;  %v583_v4 = vadd.f32 %v582_v42, %v581_v8  ;;  %v590_v21 = vadd.f32 %v589_v41, %v588_v28  ;;  %v603_v24 = vrot.slane %v602_v45, 2 }
  0x66   : > { %v563_v6 = vrot.slane %v562_v1, 1  ;;  %v570_v61 = vrot.slane %v569_v44, 1  ;;  %v597_v43 = vadd.f32 %v596_v60, %v595_v15  ;;  %v609_v25 = vadd.f32 %v608_v32, %v607_v2 }
  0x67   : > { %v577_v12 = vrot.slane %v576_v37, 1  ;;  %v584_v57 = vrot.slane %v583_v4, 1  ;;  %v591_v40 = vrot.slane %v590_v21, 1  ;;  %v604_v11 = vadd.f32 %v603_v24, %v602_v45 }
  0x68   : > { %v515_v14 = vadd.f32 %v514_v19, %v2691_v55  ;;  %v522_v26 = vadd.f32 %v521_v51, %v2693_v38  ;;  %v598_v36 = vrot.slane %v597_v43, 1  ;;  %v610_v27 = vrot.slane %v609_v25, 2 }
  0x69   : > { %v529_v50 = vadd.f32 %v528_v29, %v527_v33  ;;  %v536_v48 = vadd.f32 %v535_v49, %v534_v62  ;;  %v543_v3 = vadd.f32 %v542_v46, %v541_v56  ;;  %v605_v8 = vrot.slane %v604_v11, 1  ;;  %v3905_v29 = vld [vmem:[#allocation10_spill] sm:$0xff]  ;;  %v3907_v56 = vld [vmem:[#allocation11_spill] sm:$0xff] }
  0x6a   : > { %v550_v28 = vadd.f32 %v549_v30, %v548_v39  ;;  %v557_v42 = vadd.f32 %v556_v9, %v555_v52  ;;  %v564_v41 = vadd.f32 %v563_v6, %v562_v1  ;;  %v611_v7 = vadd.f32 %v610_v27, %v609_v25  ;;  %v3911_v1 = vld [vmem:[#allocation13_spill] sm:$0xff]  ;;  %v3919_v6 = vld [vmem:[#allocation30_spill] sm:$0xff]  ;;  %v3921_v25 = vld [vmem:[#allocation31_spill] sm:$0xff] }
  0x6b   : > { %v571_v15 = vadd.f32 %v570_v61, %v569_v44  ;;  %v578_v2 = vadd.f32 %v577_v12, %v576_v37  ;;  %v585_v60 = vadd.f32 %v584_v57, %v583_v4  ;;  %v592_v32 = vadd.f32 %v591_v40, %v590_v21 }
  0x6c   : > { %v599_v31 = vadd.f32 %v598_v36, %v597_v43  ;;  %v612_v45 = vrot.slane %v611_v7, 1  ;;  %v2719_v55 = vmul.f32 %v2703_v47, %v2378_v13  ;;  %v2722_v38 = vmul.f32 %v515_v14, %v2383_v16  ;;  %v3909_v47 = vld [vmem:[#allocation12_spill] sm:$0xff]  ;;  %v3926_v14 = vld [vmem:[#allocation33_spill] sm:$0xff] }
  0x6d   : > { %v606_v33 = vadd.f32 %v605_v8, %v604_v11  ;;  %v2725_v62 = vmul.f32 %v522_v26, %v2386_v17  ;;  %v2728_v19 = vmul.f32 %v529_v50, %v2389_v18  ;;  %v2731_v51 = vmul.f32 %v536_v48, %v2395_v22  ;;  %v3924_v11 = vld [vmem:[#allocation32_spill] sm:$0xff] }
  0x6e   : > { %3900 = vst [vmem:[#allocation41_spill] sm:$0xff] %v2719_v55  ;;  %3901 = vst [vmem:[#allocation42_spill] sm:$0xff] %v2722_v38  ;;  %v2734_v49 = vmul.f32 %v543_v3, %v3905_v29  ;;  %v2737_v39 = vmul.f32 %v550_v28, %v3907_v56  ;;  %v2740_v52 = vmul.f32 %v557_v42, %v3909_v47  ;;  %v3918_v24 = vrot.slane %v3907_v56, 1 }
  0x6f   : > { %3902 = vst [vmem:[#allocation43_spill] sm:$0xff] %v2725_v62  ;;  %3903 = vst [vmem:[#allocation44_spill] sm:$0xff] %v2728_v19  ;;  %v2743_v44 = vmul.f32 %v564_v41, %v3911_v1  ;;  %v2746_v37 = vmul.f32 %v571_v15, %v2445_v53  ;;  %v2749_v46 = vmul.f32 %v578_v2, %v2456_v58  ;;  %v3920_v43 = vrot.slane %v3909_v47, 1  ;;  %v3033_v62 = vld [vmem:[%s2334_s20 + $0xf0] sm:$0x1] }
  0x70   : > { %3904 = vst [vmem:[#allocation45_spill] sm:$0xff] %v2731_v51  ;;  %3906 = vst [vmem:[#allocation10_spill] sm:$0xff] %v2734_v49  ;;  %v2752_v30 = vmul.f32 %v585_v60, %v2459_v59  ;;  %v2755_v9 = vmul.f32 %v592_v32, %v2468_v63  ;;  %v613_v4 = vadd.f32 %v612_v45, %v611_v7  ;;  %v3923_v40 = vrot.slane %v3911_v1, 1  ;;  %v3933_v60 = vld [vmem:[#allocation40_spill] sm:$0xff]  ;;  %v3934_v32 = vld [vmem:[#allocation34_spill] sm:$0xff] }
  0x71   : > { %3908 = vst [vmem:[#allocation11_spill] sm:$0xff] %v2737_v39  ;;  %3910 = vst [vmem:[#allocation12_spill] sm:$0xff] %v2740_v52  ;;  %v2758_v21 = vmul.f32 %v599_v31, %v2471_v0  ;;  %v684_v61 = vsub.f32 %v3919_v6, %v3918_v24  ;;  %v685_v12 = vsub.f32 %v3921_v25, %v3920_v43  ;;  %v3925_v31 = vrot.slane %v2445_v53, 1  ;;  %v3935_v45 = vld [vmem:[#allocation35_spill] sm:$0xff] }
  0x72   : > { %3912 = vst [vmem:[#allocation13_spill] sm:$0xff] %v2743_v44  ;;  %3913 = vst [vmem:[#allocation46_spill] sm:$0xff] %v2746_v37  ;;  %v2767_v57 = vmul.f32 %v606_v33, %v2475_v34  ;;  %v686_v7 = vsub.f32 %v3924_v11, %v3923_v40  ;;  %v3927_v36 = vrot.slane %v2456_v58, 1  ;;  %v3928_v50 = vrot.slane %v2459_v59, 1  ;;  %v3936_v33 = vld [vmem:[#allocation36_spill] sm:$0xff]  ;;  %v3939_v43 = vld [vmem:[#allocation39_spill] sm:$0xff] }
  0x73   : > { %3914 = vst [vmem:[#allocation47_spill] sm:$0xff] %v2749_v46  ;;  %3915 = vst [vmem:[#allocation48_spill] sm:$0xff] %v2752_v30  ;;  %v687_v26 = vsub.f32 %v3926_v14, %v3925_v31  ;;  %v3929_v3 = vrot.slane %v2468_v63, 1  ;;  %v3930_v28 = vrot.slane %v2471_v0, 1  ;;  %v3931_v41 = vrot.slane %v2475_v34, 1 }
  0x74   : > { %3916 = vst [vmem:[#allocation49_spill] sm:$0xff] %v2755_v9  ;;  %3917 = vst [vmem:[#allocation50_spill] sm:$0xff] %v2758_v21  ;;  %v688_v27 = vsub.f32 %v2624_v5, %v3927_v36  ;;  %v689_v48 = vsub.f32 %v2635_v23, %v3928_v50  ;;  %v3932_v2 = vrot.slane %v2478_v35, 1  ;;  %v2795_v23 = vmul.f32 %v3934_v32, %v3934_v32  ;;  %v3945_v9 = vld [vmem:[#allocation6_spill] sm:$0xff] }
  0x75   : > { %3922 = vst [vmem:[#allocation30_spill] sm:$0xff] %v2767_v57  ;;  %v690_v8 = vsub.f32 %v2643_v20, %v3929_v3  ;;  %v691_v42 = vsub.f32 %v2649_v10, %v3930_v28  ;;  %v692_v15 = vsub.f32 %v2657_v54, %v3931_v41  ;;  %v2799_v20 = vmul.f32 %v3935_v45, %v3935_v45  ;;  %v3938_v54 = vld [vmem:[#allocation37_spill] sm:$0xff] }
  0x76   : > { %v693_v5 = vsub.f32 %v3933_v60, %v3932_v2  ;;  %v2803_v10 = vmul.f32 %v3936_v33, %v3936_v33  ;;  %v2806_v24 = vmul.f32 %v613_v4, %v2478_v35  ;;  %v2810_v6 = vmul.f32 %v3938_v54, %v3938_v54  ;;  %v2850_v60 = vld [vmem:[%s2334_s20 + $0x30] sm:$0x1]  ;;  %v2880_v54 = vld [vmem:[%s2334_s20 + $0x58] sm:$0x1]  ;;  %3971 = vst [vmem:[#allocation53_spill] sm:$0xff] %v3033_v62 }
  0x77   : > { %v2814_v25 = vmul.f32 %v3939_v43, %v3939_v43  ;;  %v2816_v40 = vmul.f32 %v684_v61, %v684_v61  ;;  %v2818_v11 = vmul.f32 %v685_v12, %v685_v12  ;;  %v2820_v31 = vmul.f32 %v686_v7, %v686_v7  ;;  %v2835_v61 = vld [vmem:[%s2334_s20 + $0x10] sm:$0x1]  ;;  %v3940_v7 = vld [vmem:[#allocation38_spill] sm:$0xff]  ;;  %v3944_v57 = vld [vmem:[#allocation5_spill] sm:$0xff] }
  0x78   : > { %3937 = vst [vmem:[#allocation31_spill] sm:$0xff] %v2806_v24  ;;  %v2822_v14 = vmul.f32 %v687_v26, %v687_v26  ;;  %v2824_v4 = vmul.f32 %v688_v27, %v688_v27  ;;  %v2826_v36 = vmul.f32 %v689_v48, %v689_v48  ;;  %v2828_v50 = vmul.f32 %v690_v8, %v690_v8  ;;  %v2843_v48 = vld [vmem:[%s2334_s20 + $0x18] sm:$0x1]  ;;  %v2864_v43 = vld [vmem:[%s2334_s20 + $0x50] sm:$0x1] }
  0x79   : > { %v2830_v3 = vmul.f32 %v691_v42, %v691_v42  ;;  %v2832_v28 = vmul.f32 %v692_v15, %v692_v15  ;;  %v2837_v12 = vmul.f32 %v693_v5, %v693_v5  ;;  %v726_v41 = vrot.slane %v3940_v7, 6  ;;  %v3943_v7 = vld [vmem:[#allocation4_spill] sm:$0xff] }
  0x7a   : > { %v727_v26 = vrot.slane %v2795_v23, 6  ;;  %v728_v27 = vrot.slane %v2799_v20, 6  ;;  %v729_v8 = vrot.slane %v2803_v10, 6  ;;  %v730_v42 = vrot.slane %v2810_v6, 6  ;;  %v2857_v20 = vld [vmem:[%s2334_s20 + $0x38] sm:$0x1] }
  0x7b   : > { %v731_v15 = vrot.slane %v2814_v25, 6  ;;  %v732_v2 = vrot.slane %v2816_v40, 6  ;;  %v733_v5 = vrot.slane %v2818_v11, 6  ;;  %v734_v32 = vrot.slane %v2820_v31, 6  ;;  %v3941_v40 = vld [vmem:[#allocation2_spill] sm:$0xff] }
  0x7c   : > { %v735_v23 = vrot.slane %v2822_v14, 6  ;;  %v736_v45 = vrot.slane %v2824_v4, 6  ;;  %v737_v33 = vrot.slane %v2826_v36, 6  ;;  %v738_v10 = vrot.slane %v2828_v50, 6  ;;  %v3942_v14 = vld [vmem:[#allocation3_spill] sm:$0xff] }
  0x7d   : > { %v775_v11 = vsel %vm774_vm1, %v3941_v40, -inf  ;;  %v777_v31 = vsel %vm776_vm2, %v2835_v61, -inf  ;;  %v785_v4 = vsel %vm774_vm1, %v3942_v14, -inf  ;;  %v786_v50 = vsel %vm776_vm2, %v2843_v48, -inf }
  0x7e   : > { %v778_v36 = vmax.f32 %v775_v11, %v777_v31  ;;  %v794_v6 = vsel %vm774_vm1, %v3943_v7, -inf  ;;  %v795_v25 = vsel %vm776_vm2, %v2850_v60, -inf  ;;  %v787_v40 = vmax.f32 %v785_v4, %v786_v50  ;;  %v3946_v4 = vld [vmem:[#allocation7_spill] sm:$0xff] }
  0x7f   : > { %v796_v24 = vmax.f32 %v794_v6, %v795_v25  ;;  %v803_v21 = vsel %vm774_vm1, %v3944_v57, -inf  ;;  %v804_v11 = vsel %vm776_vm2, %v2857_v20, -inf  ;;  %v812_v30 = vsel %vm774_vm1, %v3945_v9, -inf  ;;  %v2893_v25 = vld [vmem:[%s2334_s20 + $0x70] sm:$0x1] }
  0x80   : > { %v779_v31 = vrot.slane %v778_v36, 4  ;;  %v805_v14 = vmax.f32 %v803_v21, %v804_v11  ;;  %v813_v7 = vsel %vm776_vm2, %v2864_v43, -inf  ;;  %v788_v46 = vrot.slane %v787_v40, 4  ;;  %v2901_v9 = vld [vmem:[%s2334_s20 + $0x78] sm:$0x1] }
  0x81   : > { %v797_v37 = vrot.slane %v796_v24, 4  ;;  %v814_v44 = vmax.f32 %v812_v30, %v813_v7  ;;  %v821_v6 = vsel %vm774_vm1, %v3946_v4, -inf  ;;  %v2896_v57 = vmul.f32 %v726_v41, %v2378_v13  ;;  %v3951_v41 = vld [vmem:[#allocation8_spill] sm:$0xff] }
  0x82   : > { %v780_v50 = vmax.f32 %v778_v36, %v779_v31  ;;  %v806_v52 = vrot.slane %v805_v14, 4  ;;  %v822_v21 = vsel %vm776_vm2, %v2880_v54, -inf  ;;  %v2904_v11 = vmul.f32 %v727_v26, %v2383_v16  ;;  %v3952_v16 = vld [vmem:[#allocation9_spill] sm:$0xff] }
  0x83   : > { %3947 = vst [vmem:[#allocation32_spill] sm:$0xff] %v2896_v57  ;;  %v789_v39 = vmax.f32 %v787_v40, %v788_v46  ;;  %v798_v30 = vmax.f32 %v796_v24, %v797_v37  ;;  %v815_v7 = vrot.slane %v814_v44, 4  ;;  %v2907_v4 = vmul.f32 %v728_v27, %v2386_v17 }
  0x84   : > { %3948 = vst [vmem:[#allocation33_spill] sm:$0xff] %v2904_v11  ;;  %v2910_v49 = vmul.f32 %v729_v8, %v2389_v18  ;;  %v823_v13 = vmax.f32 %v821_v6, %v822_v21  ;;  %v830_v36 = vsel %vm774_vm1, %v3951_v41, -inf  ;;  %v781_v31 = vrot.slane %v780_v50, 2 }
  0x85   : > { %3949 = vst [vmem:[#allocation40_spill] sm:$0xff] %v2907_v4  ;;  %v807_v51 = vmax.f32 %v805_v14, %v806_v52  ;;  %v831_v19 = vsel %vm776_vm2, %v2893_v25, -inf  ;;  %v839_v46 = vsel %vm774_vm1, %v3952_v16, -inf  ;;  %v2919_v37 = vmul.f32 %v730_v42, %v2395_v22  ;;  %v2999_v16 = vld [vmem:[%s2334_s20 + $0xa0] sm:$0xff] }
  0x86   : > { %3950 = vst [vmem:[#allocation34_spill] sm:$0xff] %v2910_v49  ;;  %v790_v17 = vrot.slane %v789_v39, 2  ;;  %v799_v24 = vrot.slane %v798_v30, 2  ;;  %v840_v18 = vsel %vm776_vm2, %v2901_v9, -inf  ;;  %v2924_v26 = vmul.f32 %v731_v15, %v3905_v29 }
  0x87   : > { %3953 = vst [vmem:[#allocation35_spill] sm:$0xff] %v2919_v37  ;;  %v2927_v52 = vmul.f32 %v732_v2, %v3907_v56  ;;  %v2930_v27 = vmul.f32 %v733_v5, %v3909_v47  ;;  %v816_v8 = vmax.f32 %v814_v44, %v815_v7  ;;  %v2933_v22 = vmul.f32 %v734_v32, %v3911_v1  ;;  %v2942_v2 = vld [vmem:[%s2334_s20 + $0x90] sm:$0x1] }
  0x88   : > { %3954 = vst [vmem:[#allocation36_spill] sm:$0xff] %v2924_v26  ;;  %v824_v42 = vrot.slane %v823_v13, 4  ;;  %v832_v40 = vmax.f32 %v830_v36, %v831_v19  ;;  %v841_v14 = vmax.f32 %v839_v46, %v840_v18  ;;  %v2936_v6 = vmul.f32 %v735_v23, %v2445_v53  ;;  %v2955_v53 = vld [vmem:[%s2334_s20 + $0x98] sm:$0x1] }
  0x89   : > { %3955 = vst [vmem:[#allocation37_spill] sm:$0xff] %v2927_v52  ;;  %3956 = vst [vmem:[#allocation39_spill] sm:$0xff] %v2930_v27  ;;  %v2939_v29 = vmul.f32 %v736_v45, %v2456_v58  ;;  %v782_v56 = vmax.f32 %v780_v50, %v781_v31  ;;  %v808_v15 = vrot.slane %v807_v51, 2  ;;  %v2945_v47 = vmul.f32 %v737_v33, %v2459_v59  ;;  %v2973_v45 = vld [vmem:[%s2334_s20 + $0xb0] sm:$0x1]  ;;  %v2976_v50 = vld [vmem:[%s2334_s20 + $0x80] sm:$0xff] }
  0x8a   : > { %3957 = vst [vmem:[#allocation38_spill] sm:$0xff] %v2933_v22  ;;  %3958 = vst [vmem:[#allocation2_spill] sm:$0xff] %v2936_v6  ;;  %v2948_v1 = vmul.f32 %v738_v10, %v2468_v63  ;;  %v2950_v19 = vmax.f32 %v789_v39, %v790_v17  ;;  %v2952_v44 = vmax.f32 %v798_v30, %v799_v24  ;;  %v3962_v58 = vrot.slane %v2830_v3, 6  ;;  %v2990_v30 = vld [vmem:[%s2334_s20 + $0xb8] sm:$0x1]  ;;  %v3049_v22 = vld [vmem:[%s2334_s20 + $0xe8] sm:$0xff] }
  0x8b   : > { %3959 = vst [vmem:[#allocation3_spill] sm:$0xff] %v2939_v29  ;;  %3960 = vst [vmem:[#allocation4_spill] sm:$0xff] %v2945_v47  ;;  %v3964_v59 = vrot.slane %v2832_v28, 6  ;;  %v3966_v63 = vrot.slane %v2837_v12, 6  ;;  %v817_v23 = vrot.slane %v816_v8, 2  ;;  %v825_v33 = vmax.f32 %v823_v13, %v824_v42  ;;  %v2985_v12 = vld [vmem:[%s2334_s20 + $0x88] sm:$0xff] }
  0x8c   : > { %3961 = vst [vmem:[#allocation5_spill] sm:$0xff] %v2948_v1  ;;  %v2960_v5 = vmul.f32 %v3962_v58, %v2471_v0  ;;  %v833_v10 = vrot.slane %v832_v40, 4  ;;  %v842_v3 = vrot.slane %v841_v14, 4  ;;  %3968 = vst [vmem:[#allocation9_spill] sm:$0xff] %v2976_v50  ;;  %v848_v0 = vsel %vm774_vm1, %v2976_v50, -inf  ;;  %v3028_v13 = vld [vmem:[%s2334_s20 + $0xc8] sm:$0xff] }
  0x8d   : > { %v2965_v32 = vmul.f32 %v3964_v59, %v2475_v34  ;;  %v2970_v39 = vmul.f32 %v3966_v63, %v2478_v35  ;;  %v783_v34 = vrot.slane %v782_v56, 1  ;;  %v2980_v28 = vmax.f32 %v807_v51, %v808_v15  ;;  %v3006_v24 = vld [vmem:[%s2334_s20 + $0xd0] sm:$0x1]  ;;  %3970 = vst [vmem:[#allocation52_spill] sm:$0xff] %v3028_v13  ;;  %3973 = vst [vmem:[#allocation55_spill] sm:$0xff] %v3049_v22 }
  0x8e   : > { %3963 = vst [vmem:[#allocation6_spill] sm:$0xff] %v2960_v5  ;;  %v849_v35 = vsel %vm776_vm2, %v2942_v2, -inf  ;;  %v857_v21 = vsel %vm774_vm1, %v2985_v12, -inf  ;;  %v858_v51 = vsel %vm776_vm2, %v2955_v53, -inf  ;;  %v2996_v36 = vmax.f32 %v816_v8, %v817_v23  ;;  %v3009_v8 = vld [vmem:[%s2334_s20 + $0xa8] sm:$0xff]  ;;  %v3042_v5 = vld [vmem:[%s2334_s20 + $0xe0] sm:$0xff] }
  0x8f   : > { %3965 = vst [vmem:[#allocation7_spill] sm:$0xff] %v2965_v32  ;;  %3967 = vst [vmem:[#allocation8_spill] sm:$0xff] %v2970_v39  ;;  %v850_v41 = vmax.f32 %v848_v0, %v849_v35  ;;  %v859_v31 = vmax.f32 %v857_v21, %v858_v51  ;;  %v866_v46 = vsel %vm774_vm1, %v2999_v16, -inf  ;;  %v867_v17 = vsel %vm776_vm2, %v2973_v45, -inf  ;;  %v3016_v0 = vld [vmem:[%s2334_s20 + $0xc0] sm:$0xff] }
  0x90   : > { %v834_v18 = vmax.f32 %v832_v40, %v833_v10  ;;  %v843_v42 = vmax.f32 %v841_v14, %v842_v3  ;;  %v868_v58 = vmax.f32 %v866_v46, %v867_v17  ;;  %v875_v63 = vsel %vm774_vm1, %v3009_v8, -inf  ;;  %v3021_v40 = vld [vmem:[%s2334_s20 + $0xd8] sm:$0x1]  ;;  %3972 = vst [vmem:[#allocation54_spill] sm:$0xff] %v3042_v5 }
  0x91   : > { %v851_v15 = vrot.slane %v850_v41, 4  ;;  %v860_v59 = vrot.slane %v859_v31, 4  ;;  %v876_v23 = vsel %vm776_vm2, %v2990_v30, -inf  ;;  %v884_v35 = vsel %vm774_vm1, %v3016_v0, -inf  ;;  %3969 = vst [vmem:[#allocation51_spill] sm:$0xff] %v3021_v40 }
  0x92   : > { %v3023_v14 = vmax.f32 %v782_v56, %v783_v34  ;;  %v826_v10 = vrot.slane %v825_v33, 2  ;;  %v869_v21 = vrot.slane %v868_v58, 4  ;;  %v877_v46 = vmax.f32 %v875_v63, %v876_v23  ;;  %v3039_v63 = vld [vmem:[%s2334_s20 + $0xf8] sm:$0x1] }
  0x93   : > { %v852_v3 = vmax.f32 %v850_v41, %v851_v15  ;;  %v861_v51 = vmax.f32 %v859_v31, %v860_v59  ;;  %v885_v17 = vsel %vm776_vm2, %v3006_v24, -inf  ;;  %v893_v7 = vsel %vm774_vm1, %v3028_v13, -inf }
  0x94   : > { %v810_v56 = vrot.slane %v2980_v28, 1  ;;  %v835_v34 = vrot.slane %v834_v18, 2  ;;  %v870_v38 = vmax.f32 %v868_v58, %v869_v21  ;;  %v886_v41 = vmax.f32 %v884_v35, %v885_v17 }
  0x95   : > { %v844_v15 = vrot.slane %v843_v42, 2  ;;  %v853_v55 = vrot.slane %v852_v3, 2  ;;  %v878_v31 = vrot.slane %v877_v46, 4  ;;  %v894_v59 = vsel %vm776_vm2, %v3021_v40, -inf }
  0x96   : > { %v862_v23 = vrot.slane %v861_v51, 2  ;;  %v887_v39 = vrot.slane %v886_v41, 4  ;;  %v895_v32 = vmax.f32 %v893_v7, %v894_v59  ;;  %v902_v1 = vsel %vm774_vm1, %v3042_v5, -inf }
  0x97   : > { %v827_v47 = vmax.f32 %v825_v33, %v826_v10  ;;  %v871_v58 = vrot.slane %v870_v38, 2  ;;  %v879_v35 = vmax.f32 %v877_v46, %v878_v31  ;;  %v903_v21 = vsel %vm776_vm2, %v3033_v62, -inf }
  0x98   : > { %v836_v17 = vmax.f32 %v834_v18, %v835_v34  ;;  %v888_v29 = vmax.f32 %v886_v41, %v887_v39  ;;  %v896_v6 = vrot.slane %v895_v32, 4  ;;  %v911_v27 = vsel %vm774_vm1, %v3049_v22, -inf }
  0x99   : > { %v845_v7 = vmax.f32 %v843_v42, %v844_v15  ;;  %v880_v59 = vrot.slane %v879_v35, 2  ;;  %v904_v52 = vmax.f32 %v902_v1, %v903_v21  ;;  %v912_v26 = vsel %vm776_vm2, %v3039_v63, -inf }
  0x9a   : > { %v854_v33 = vmax.f32 %v852_v3, %v853_v55  ;;  %v863_v10 = vmax.f32 %v861_v51, %v862_v23  ;;  %v889_v46 = vrot.slane %v888_v29, 2  ;;  %v897_v31 = vmax.f32 %v895_v32, %v896_v6 }
  0x9b   : > { %v819_v37 = vrot.slane %v2996_v36, 1  ;;  %v872_v18 = vmax.f32 %v870_v38, %v871_v58  ;;  %v905_v39 = vrot.slane %v904_v52, 4  ;;  %v913_v34 = vmax.f32 %v911_v27, %v912_v26 }
  0x9c   : > { %v828_v41 = vrot.slane %v827_v47, 1  ;;  %v881_v49 = vmax.f32 %v879_v35, %v880_v59  ;;  %v890_v4 = vmax.f32 %v888_v29, %v889_v46  ;;  %v898_v11 = vrot.slane %v897_v31, 2 }
  0x9d   : > { %v837_v57 = vrot.slane %v836_v17, 1  ;;  %v846_v42 = vrot.slane %v845_v7, 1  ;;  %v906_v15 = vmax.f32 %v904_v52, %v905_v39  ;;  %v914_v1 = vrot.slane %v913_v34, 4 }
  0x9e   : > { %v3974_v21 = vrot.slane %v2950_v19, 1  ;;  %v855_v3 = vrot.slane %v854_v33, 1  ;;  %v864_v6 = vrot.slane %v863_v10, 1  ;;  %v899_v32 = vmax.f32 %v897_v31, %v898_v11 }
  0x9f   : > { %v3976_v38 = vrot.slane %v2952_v44, 1  ;;  %v873_v27 = vrot.slane %v872_v18, 1  ;;  %v907_v29 = vrot.slane %v906_v15, 2  ;;  %v915_v51 = vmax.f32 %v913_v34, %v914_v1 }
  0xa0   : > { %v3059_v55 = vmax.f32 %v2950_v19, %v3974_v21  ;;  %v3067_v52 = vmax.f32 %v2980_v28, %v810_v56  ;;  %v3070_v23 = vmax.f32 %v2996_v36, %v819_v37  ;;  %v882_v19 = vrot.slane %v881_v49, 1  ;;  %v3085_v37 = vld [vmem:[%s2334_s20] sm:$0xff] }
  0xa1   : > { %v3064_v26 = vmax.f32 %v2952_v44, %v3976_v38  ;;  %v891_v58 = vrot.slane %v890_v4, 1  ;;  %v3072_v35 = vmax.f32 %v827_v47, %v828_v41  ;;  %v3074_v11 = vmax.f32 %v836_v17, %v837_v57  ;;  %v3090_v57 = vld [vmem:[%s2334_s20 + $0x8] sm:$0xff] }
  0xa2   : > { %3975 = vst [vmem:[#allocation56_spill] sm:$0xff] %v3059_v55  ;;  %3978 = vst [vmem:[#allocation58_spill] sm:$0xff] %v3067_v52  ;;  %v3076_v44 = vmax.f32 %v845_v7, %v846_v42  ;;  %v916_v59 = vrot.slane %v915_v51, 2  ;;  %v3078_v46 = vmax.f32 %v854_v33, %v855_v3  ;;  %v3080_v31 = vmax.f32 %v863_v10, %v864_v6  ;;  %v3108_v42 = vld [vmem:[%s2334_s20 + $0x28] sm:$0xff]  ;;  %v3119_v3 = vld [vmem:[%s2334_s20 + $0x40] sm:$0xff] }
  0xa3   : > { %3977 = vst [vmem:[#allocation57_spill] sm:$0xff] %v3064_v26  ;;  %3979 = vst [vmem:[#allocation59_spill] sm:$0xff] %v3070_v23  ;;  %v900_v28 = vrot.slane %v899_v32, 1  ;;  %v908_v56 = vmax.f32 %v906_v15, %v907_v29  ;;  %v3082_v39 = vmax.f32 %v872_v18, %v873_v27  ;;  %v920_v47 = vsub.f32 %v3085_v37, %v3023_v14  ;;  %v3103_v18 = vld [vmem:[%s2334_s20 + $0x20] sm:$0xff]  ;;  %v3124_v38 = vld [vmem:[%s2334_s20 + $0x48] sm:$0xff] }
  0xa4   : > { %3980 = vst [vmem:[#allocation60_spill] sm:$0xff] %v3072_v35  ;;  %3981 = vst [vmem:[#allocation61_spill] sm:$0xff] %v3074_v11  ;;  %v921_v36 = vsub.f32 %v3090_v57, %v3059_v55  ;;  %v922_v17 = vsub.f32 %v2835_v61, %v3023_v14  ;;  %v3096_v7 = vmax.f32 %v881_v49, %v882_v19  ;;  %v3133_v19 = vld [vmem:[%s2334_s20 + $0x60] sm:$0xff] }
  0xa5   : > { %3982 = vst [vmem:[#allocation62_spill] sm:$0xff] %v3076_v44  ;;  %v3098_v33 = vmax.f32 %v890_v4, %v891_v58  ;;  %v923_v10 = vsub.f32 %v2843_v48, %v3059_v55  ;;  %v924_v34 = vsub.f32 %v3103_v18, %v3064_v26  ;;  %v917_v41 = vmax.f32 %v915_v51, %v916_v59  ;;  %v3138_v58 = vld [vmem:[%s2334_s20 + $0x68] sm:$0xff] }
  0xa6   : > { %3983 = vst [vmem:[#allocation63_spill] sm:$0xff] %v3096_v7  ;;  %v925_v15 = vsub.f32 %v3108_v42, %v3067_v52  ;;  %v926_v49 = vsub.f32 %v2850_v60, %v3064_v26  ;;  %v927_v4 = vsub.f32 %v2857_v20, %v3067_v52  ;;  %v3116_v1 = vmax.f32 %v899_v32, %v900_v28 }
  0xa7   : > { %3984 = vst [vmem:[#allocation64_spill] sm:$0xff] %v3098_v33  ;;  %v909_v21 = vrot.slane %v908_v56, 1  ;;  %v928_v6 = vsub.f32 %v3119_v3, %v3070_v23  ;;  %3986 = vst [vmem:[#allocation66_spill] sm:$0xff] %v3124_v38  ;;  %v929_v27 = vsub.f32 %v3124_v38, %v3072_v35  ;;  %v930_v29 = vsub.f32 %v2864_v43, %v3070_v23 }
  0xa8   : > { %3985 = vst [vmem:[#allocation65_spill] sm:$0xff] %v3116_v1  ;;  %v931_v51 = vsub.f32 %v2880_v54, %v3072_v35  ;;  %3987 = vst [vmem:[#allocation67_spill] sm:$0xff] %v3133_v19  ;;  %v932_v32 = vsub.f32 %v3133_v19, %v3074_v11  ;;  %v933_v59 = vsub.f32 %v3138_v58, %v3076_v44  ;;  %v952_v54 = vmul.f32 1.442695, %v920_v47 }
  0xa9   : > { %3988 = vst [vmem:[#allocation68_spill] sm:$0xff] %v3138_v58  ;;  %v934_v28 = vsub.f32 %v2893_v25, %v3074_v11  ;;  %v935_v52 = vsub.f32 %v2901_v9, %v3076_v44  ;;  %v936_v43 = vsub.f32 %v2976_v50, %v3078_v46  ;;  %v918_v35 = vrot.slane %v917_v41, 1 }
  0xaa   : > { %v937_v23 = vsub.f32 %v2985_v12, %v3080_v31  ;;  %v954_v26 = vmul.f32 1.442695, %v921_v36  ;;  %v956_v55 = vmul.f32 1.442695, %v922_v17  ;;  %v3150_v19 = vmax.f32 %v908_v56, %v909_v21 }
  0xab   : > { %2129 = vpow2.f32 %v952_v54  ;;  %v958_v58 = vmul.f32 1.442695, %v923_v10  ;;  %v960_v38 = vmul.f32 1.442695, %v924_v34  ;;  %v938_v11 = vsub.f32 %v2942_v2, %v3078_v46 }
  0xac   : > { %3989 = vst [vmem:[#allocation69_spill] sm:$0xff] %v3150_v19  ;;  %v939_v44 = vsub.f32 %v2955_v53, %v3080_v31  ;;  %2131 = vpow2.f32 %v954_v26  ;;  %v962_v50 = vmul.f32 1.442695, %v925_v15  ;;  %v940_v47 = vsub.f32 %v2999_v16, %v3082_v39 }
  0xad   : > { %v941_v36 = vsub.f32 %v3009_v8, %v3096_v7  ;;  %2133 = vpow2.f32 %v956_v55  ;;  %v964_v56 = vmul.f32 1.442695, %v926_v49  ;;  %v3160_v17 = vmax.f32 %v917_v41, %v918_v35 }
  0xae   : > { %v942_v10 = vsub.f32 %v2973_v45, %v3082_v39  ;;  %2135 = vpow2.f32 %v958_v58  ;;  %v966_v34 = vmul.f32 1.442695, %v927_v4  ;;  %v943_v21 = vsub.f32 %v2990_v30, %v3096_v7 }
  0xaf   : > { %3990 = vst [vmem:[#allocation70_spill] sm:$0xff] %v3160_v17  ;;  %v944_v26 = vsub.f32 %v3016_v0, %v3098_v33  ;;  %2137 = vpow2.f32 %v960_v38  ;;  %v968_v15 = vmul.f32 1.442695, %v928_v6  ;;  %v945_v54 = vsub.f32 %v3028_v13, %v3116_v1 }
  0xb0   : > { %v946_v55 = vsub.f32 %v3006_v24, %v3098_v33  ;;  %2139 = vpow2.f32 %v962_v50  ;;  %v970_v35 = vmul.f32 1.442695, %v929_v27  ;;  %v947_v41 = vsub.f32 %v3021_v40, %v3116_v1 }
  0xb1   : > { %v948_v49 = vsub.f32 %v3042_v5, %v3150_v19  ;;  %2141 = vpow2.f32 %v964_v56  ;;  %v972_v4 = vmul.f32 1.442695, %v930_v29  ;;  %v949_v38 = vsub.f32 %v3049_v22, %v3160_v17 }
  0xb2   : > { %v950_v6 = vsub.f32 %v3033_v62, %v3150_v19  ;;  %2143 = vpow2.f32 %v966_v34  ;;  %v974_v58 = vmul.f32 1.442695, %v931_v51  ;;  %v951_v50 = vsub.f32 %v3039_v63, %v3160_v17 }
  0xb3   : > { %2145 = vpow2.f32 %v968_v15  ;;  %v976_v27 = vmul.f32 1.442695, %v932_v32  ;;  %v978_v33 = vmul.f32 1.442695, %v933_v59  ;;  %v980_v1 = vmul.f32 1.442695, %v934_v28 }
  0xb4   : > { %2147 = vpow2.f32 %v970_v35  ;;  %v982_v40 = vmul.f32 1.442695, %v935_v52  ;;  %v984_v5 = vmul.f32 1.442695, %v936_v43  ;;  %v986_v29 = vmul.f32 1.442695, %v937_v23 }
  0xb5   : > { %2149 = vpow2.f32 %v972_v4  ;;  %v988_v56 = vmul.f32 1.442695, %v938_v11  ;;  %v990_v13 = vmul.f32 1.442695, %v939_v44  ;;  %v992_v22 = vmul.f32 1.442695, %v940_v47 }
  0xb6   : > { %2151 = vpow2.f32 %v974_v58  ;;  %v994_v7 = vmul.f32 1.442695, %v941_v36  ;;  %v996_v19 = vmul.f32 1.442695, %v942_v10  ;;  %v998_v51 = vmul.f32 1.442695, %v943_v21 }
  0xb7   : > { %2153 = vpow2.f32 %v976_v27  ;;  %v1000_v34 = vmul.f32 1.442695, %v944_v26  ;;  %v1002_v62 = vmul.f32 1.442695, %v945_v54  ;;  %v3182_v32 = vmul.f32 1.442695, %v946_v55 }
  0xb8   : > { %v2130_v17 = vpop.eup %2129  ;;  %2155 = vpow2.f32 %v978_v33  ;;  %v3184_v59 = vmul.f32 1.442695, %v947_v41  ;;  %v3186_v52 = vmul.f32 1.442695, %v948_v49  ;;  %v3188_v23 = vmul.f32 1.442695, %v949_v38 }
  0xb9   : > { %v2132_v28 = vpop.eup %2131  ;;  %2157 = vpow2.f32 %v980_v1  ;;  %v3190_v11 = vmul.f32 1.442695, %v950_v6  ;;  %v1049_v44 = vrot.slane %v2130_v17, 5  ;;  %v3192_v47 = vmul.f32 1.442695, %v951_v50 }
  0xba   : > { %v2134_v43 = vpop.eup %2133  ;;  %2159 = vpow2.f32 %v982_v40  ;;  %v1052_v36 = vrot.slane %v2132_v28, 5  ;;  %v1274_v21 = vlaneseq  ;;  %v1388_v1 = vrot.slane %v3085_v37, 5 }
  0xbb   : > { %v2136_v33 = vpop.eup %2135  ;;  %2161 = vpow2.f32 %v984_v5  ;;  %v1050_v10 = vrot.slane %v2134_v43, 5  ;;  %v1389_v54 = vrot.slane %v2835_v61, 5  ;;  %v1391_v35 = vrot.slane %v3090_v57, 5 }
  0xbc   : > { %v2138_v26 = vpop.eup %2137  ;;  %2163 = vpow2.f32 %v986_v29  ;;  %v1053_v15 = vrot.slane %v2136_v33, 5  ;;  %v1392_v4 = vrot.slane %v2843_v48, 5  ;;  %v3202_v27 = vshrl.u32 %v1274_v21, 7 }
  0xbd   : > { %v2140_v55 = vpop.eup %2139  ;;  %2165 = vpow2.f32 %v988_v56  ;;  %v1051_v40 = vsel %vm3842_vm3, %v1049_v44, %v1050_v10  ;;  %v1055_v17 = vrot.slane %v2138_v26, 5  ;;  %v1394_v57 = vrot.slane %v3103_v18, 5 }
  0xbe   : > { %v2142_v41 = vpop.eup %2141  ;;  %2167 = vpow2.f32 %v990_v13  ;;  %v1054_v5 = vsel %vm3842_vm3, %v1052_v36, %v1053_v15  ;;  %v1114_v49 = vsel %vm3841_vm4, %v1051_v40, 0.0  ;;  %v1058_v56 = vrot.slane %v2140_v55, 5 }
  0xbf   : > { %v2144_v38 = vpop.eup %2143  ;;  %2169 = vpow2.f32 %v992_v22  ;;  %v1056_v37 = vrot.slane %v2142_v41, 5  ;;  %v1115_v6 = vrot.slane %v1114_v49, 4  ;;  %v1121_v61 = vsel %vm3841_vm4, %v1054_v5, 0.0 }
  0xc0   : > { %v2146_v58 = vpop.eup %2145  ;;  %2171 = vpow2.f32 %v994_v7  ;;  %v1122_v50 = vrot.slane %v1121_v61, 4  ;;  %v1059_v28 = vrot.slane %v2144_v38, 5  ;;  %v3207_v44 = vsel %vm3842_vm3, %v1388_v1, %v1389_v54 }
  0xc1   : > { %v2148_v13 = vpop.eup %2147  ;;  %2173 = vpow2.f32 %v996_v19  ;;  %v1057_v29 = vsel %vm3842_vm3, %v1055_v17, %v1056_v37  ;;  %v1116_v22 = vadd.f32 %v1115_v6, %v1114_v49  ;;  %v1395_v43 = vrot.slane %v2850_v60, 5 }
  0xc2   : > { %v2150_v48 = vpop.eup %2149  ;;  %2175 = vpow2.f32 %v998_v51  ;;  %v1123_v36 = vadd.f32 %v1122_v50, %v1121_v61  ;;  %v1128_v33 = vsel %vm3841_vm4, %v1057_v29, 0.0  ;;  %v3212_v18 = vsel %vm3842_vm3, %v1391_v35, %v1392_v4 }
  0xc3   : > { %v2152_v7 = vpop.eup %2151  ;;  %2177 = vpow2.f32 %v1000_v34  ;;  %3991 = vst [vmem:[#allocation71_spill] sm:$0xff] %v3212_v18  ;;  %v1061_v10 = vrot.slane %v2146_v58, 5  ;;  %v1062_v21 = vrot.slane %v2150_v48, 5  ;;  %v1129_v26 = vrot.slane %v1128_v33, 4 }
  0xc4   : > { %v2154_v19 = vpop.eup %2153  ;;  %2179 = vpow2.f32 %v1002_v62  ;;  %v1060_v15 = vsel %vm3842_vm3, %v1058_v56, %v1059_v28  ;;  %v1064_v1 = vrot.slane %v2148_v13, 5  ;;  %v1065_v60 = vrot.slane %v2152_v7, 5 }
  0xc5   : > { %v2156_v51 = vpop.eup %2155  ;;  %2181 = vpow2.f32 %v3182_v32  ;;  %v1067_v34 = vrot.slane %v2154_v19, 5  ;;  %v1117_v55 = vrot.slane %v1116_v22, 2  ;;  %v1124_v35 = vrot.slane %v1123_v36, 2 }
  0xc6   : > { %v2158_v54 = vpop.eup %2157  ;;  %2183 = vpow2.f32 %v3184_v59  ;;  %v1130_v41 = vadd.f32 %v1129_v26, %v1128_v33  ;;  %v1063_v32 = vsel %vm3842_vm3, %v1061_v10, %v1062_v21  ;;  %v1135_v49 = vsel %vm3841_vm4, %v1060_v15, 0.0 }
  0xc7   : > { %v2160_v17 = vpop.eup %2159  ;;  %2185 = vpow2.f32 %v3186_v52  ;;  %v1068_v62 = vrot.slane %v2158_v54, 5  ;;  %v3223_v4 = vsub.s32 7, %v3202_v27  ;;  %v1066_v38 = vsel %vm3842_vm3, %v1064_v1, %v1065_v60 }
  0xc8   : > { %v2162_v5 = vpop.eup %2161  ;;  %2187 = vpow2.f32 %v3188_v23  ;;  %v1070_v37 = vrot.slane %v2156_v51, 5  ;;  %v1071_v52 = vrot.slane %v2160_v17, 5  ;;  %v1118_v23 = vadd.f32 %v1117_v55, %v1116_v22 }
  0xc9   : > { %v2164_v59 = vpop.eup %2163  ;;  %2189 = vpow2.f32 %v3190_v11  ;;  %v1069_v61 = vsel %vm3842_vm3, %v1067_v34, %v1068_v62  ;;  %v3230_v58 = vsel %vm3842_vm3, %v1394_v57, %v1395_v43  ;;  %v1125_v13 = vadd.f32 %v1124_v35, %v1123_v36 }
  0xca   : > { %v2166_v6 = vpop.eup %2165  ;;  %2191 = vpow2.f32 %v3192_v47  ;;  %3992 = vst [vmem:[#allocation72_spill] sm:$0xff] %v3230_v58  ;;  %v1131_v29 = vrot.slane %v1130_v41, 2  ;;  %v1136_v56 = vrot.slane %v1135_v49, 4  ;;  %v1142_v28 = vsel %vm3841_vm4, %v1063_v32, 0.0 }
  0xcb   : > { %v2168_v50 = vpop.eup %2167  ;;  %v1073_v48 = vrot.slane %v2162_v5, 5  ;;  %v1074_v7 = vrot.slane %v2166_v6, 5  ;;  %v1143_v33 = vrot.slane %v1142_v28, 4  ;;  %v1149_v19 = vsel %vm3841_vm4, %v1066_v38, 0.0 }
  0xcc   : > { %v2170_v11 = vpop.eup %2169  ;;  %v1072_v47 = vsel %vm3842_vm3, %v1070_v37, %v1071_v52  ;;  %v1132_v21 = vadd.f32 %v1131_v29, %v1130_v41  ;;  %v1137_v22 = vadd.f32 %v1136_v56, %v1135_v49  ;;  %v1156_v57 = vsel %vm3841_vm4, %v1069_v61, 0.0 }
  0xcd   : > { %v2172_v10 = vpop.eup %2171  ;;  %v1119_v26 = vrot.slane %v1118_v23, 1  ;;  %v1144_v36 = vadd.f32 %v1143_v33, %v1142_v28  ;;  %v1150_v51 = vrot.slane %v1149_v19, 4  ;;  %v1076_v60 = vrot.slane %v2164_v59, 5 }
  0xce   : > { %v2174_v43 = vpop.eup %2173  ;;  %v1077_v54 = vrot.slane %v2168_v50, 5  ;;  %v1126_v34 = vrot.slane %v1125_v13, 1  ;;  %v1138_v55 = vrot.slane %v1137_v22, 2  ;;  %v1075_v62 = vsel %vm3842_vm3, %v1073_v48, %v1074_v7 }
  0xcf   : > { %v2176_v1 = vpop.eup %2175  ;;  %v1145_v35 = vrot.slane %v1144_v36, 2  ;;  %v1157_v5 = vrot.slane %v1156_v57, 4  ;;  %v1163_v41 = vsel %vm3841_vm4, %v1072_v47, 0.0  ;;  %v1079_v49 = vrot.slane %v2170_v11, 5 }
  0xd0   : > { %v2178_v17 = vpop.eup %2177  ;;  %v1080_v38 = vrot.slane %v2174_v43, 5  ;;  %v1082_v37 = vrot.slane %v2172_v10, 5  ;;  %v1133_v52 = vrot.slane %v1132_v21, 1  ;;  %v1083_v61 = vrot.slane %v2176_v1, 5 }
  0xd1   : > { %v2180_v32 = vpop.eup %2179  ;;  %v1139_v29 = vadd.f32 %v1138_v55, %v1137_v22  ;;  %v3239_v56 = vadd.f32 %v1145_v35, %v1144_v36  ;;  %v1151_v59 = vadd.f32 %v1150_v51, %v1149_v19  ;;  %v1078_v28 = vsel %vm3842_vm3, %v1076_v60, %v1077_v54 }
  0xd2   : > { %v2182_v6 = vpop.eup %2181  ;;  %v3242_v33 = vadd.f32 %v1119_v26, %v1118_v23  ;;  %v3244_v48 = vadd.f32 %v1126_v34, %v1125_v13  ;;  %v1164_v7 = vrot.slane %v1163_v41, 4  ;;  %v1085_v40 = vrot.slane %v2178_v17, 5 }
  0xd3   : > { %v2184_v50 = vpop.eup %2183  ;;  %v1086_v11 = vrot.slane %v2182_v6, 5  ;;  %v1158_v43 = vadd.f32 %v1157_v5, %v1156_v57  ;;  %v1170_v10 = vsel %vm3841_vm4, %v1075_v62, 0.0  ;;  %v1081_v22 = vsel %vm3842_vm3, %v1079_v49, %v1080_v38 }
  0xd4   : > { %v2186_v47 = vpop.eup %2185  ;;  %v1088_v36 = vrot.slane %v2180_v32, 5  ;;  %v1089_v1 = vrot.slane %v2184_v50, 5  ;;  %v3248_v19 = vadd.f32 %v1133_v52, %v1132_v21  ;;  %v1084_v23 = vsel %vm3842_vm3, %v1082_v37, %v1083_v61 }
  0xd5   : > { %v2188_v15 = vpop.eup %2187  ;;  %v1140_v26 = vrot.slane %v1139_v29, 1  ;;  %v1147_v13 = vrot.slane %v3239_v56, 1  ;;  %v1152_v60 = vrot.slane %v1151_v59, 2  ;;  %v1091_v34 = vrot.slane %v2186_v47, 5 }
  0xd6   : > { %v2190_v51 = vpop.eup %2189  ;;  %v1165_v57 = vadd.f32 %v1164_v7, %v1163_v41  ;;  %v1171_v17 = vrot.slane %v1170_v10, 4  ;;  %v1087_v62 = vsel %vm3842_vm3, %v1085_v40, %v1086_v11  ;;  %v1159_v35 = vrot.slane %v1158_v43, 2 }
  0xd7   : > { %v2192_v54 = vpop.eup %2191  ;;  %v1092_v55 = vrot.slane %v2190_v51, 5  ;;  %v1177_v5 = vsel %vm3841_vm4, %v1078_v28, 0.0  ;;  %v1184_v21 = vsel %vm3841_vm4, %v1081_v22, 0.0  ;;  %v1090_v32 = vsel %vm3842_vm3, %v1088_v36, %v1089_v1 }
  0xd8   : > { %v1094_v49 = vrot.slane %v2188_v15, 5  ;;  %v1095_v38 = vrot.slane %v2192_v54, 5  ;;  %v1172_v37 = vadd.f32 %v1171_v17, %v1170_v10  ;;  %v1153_v52 = vadd.f32 %v1152_v60, %v1151_v59 }
  0xd9   : > { %v1178_v6 = vrot.slane %v1177_v5, 4  ;;  %v1185_v61 = vrot.slane %v1184_v21, 4  ;;  %v1191_v50 = vsel %vm3841_vm4, %v1084_v23, 0.0  ;;  %v1093_v41 = vsel %vm3842_vm3, %v1091_v34, %v1092_v55 }
  0xda   : > { %v1166_v7 = vrot.slane %v1165_v57, 2  ;;  %v1173_v47 = vrot.slane %v1172_v37, 2  ;;  %v1192_v40 = vrot.slane %v1191_v50, 4  ;;  %v1198_v28 = vsel %vm3841_vm4, %v1087_v62, 0.0 }
  0xdb   : > { %v1179_v11 = vadd.f32 %v1178_v6, %v1177_v5  ;;  %v1186_v51 = vadd.f32 %v1185_v61, %v1184_v21  ;;  %v1205_v22 = vsel %vm3841_vm4, %v1090_v32, 0.0  ;;  %v1096_v15 = vsel %vm3842_vm3, %v1094_v49, %v1095_v38 }
  0xdc   : > { %v1160_v36 = vadd.f32 %v1159_v35, %v1158_v43  ;;  %v1193_v10 = vadd.f32 %v1192_v40, %v1191_v50  ;;  %v1199_v59 = vrot.slane %v1198_v28, 4  ;;  %v1206_v54 = vrot.slane %v1205_v22, 4 }
  0xdd   : > { %v1180_v1 = vrot.slane %v1179_v11, 2  ;;  %v1187_v60 = vrot.slane %v1186_v51, 2  ;;  %v1212_v23 = vsel %vm3841_vm4, %v1093_v41, 0.0  ;;  %v1141_v34 = vadd.f32 %v1140_v26, %v1139_v29 }
  0xde   : > { %v1167_v55 = vadd.f32 %v1166_v7, %v1165_v57  ;;  %v1194_v17 = vrot.slane %v1193_v10, 2  ;;  %v1200_v58 = vadd.f32 %v1199_v59, %v1198_v28  ;;  %v1154_v5 = vrot.slane %v1153_v52, 1 }
  0xdf   : > { %v1174_v21 = vadd.f32 %v1173_v47, %v1172_v37  ;;  %v1207_v6 = vadd.f32 %v1206_v54, %v1205_v22  ;;  %v1213_v62 = vrot.slane %v1212_v23, 4  ;;  %v1148_v32 = vadd.f32 %v1147_v13, %v3239_v56 }
  0xe0   : > { %v1181_v61 = vadd.f32 %v1180_v1, %v1179_v11  ;;  %v1201_v49 = vrot.slane %v1200_v58, 2  ;;  %v1219_v43 = vsel %vm3841_vm4, %v1096_v15, 0.0  ;;  %v1161_v35 = vrot.slane %v1160_v36, 1 }
  0xe1   : > { %v1188_v38 = vadd.f32 %v1187_v60, %v1186_v51  ;;  %v1208_v50 = vrot.slane %v1207_v6, 2  ;;  %v1214_v40 = vadd.f32 %v1213_v62, %v1212_v23  ;;  %v1168_v18 = vrot.slane %v1167_v55, 1 }
  0xe2   : > { %v1195_v41 = vadd.f32 %v1194_v17, %v1193_v10  ;;  %v1220_v29 = vrot.slane %v1219_v43, 4  ;;  %2193 = vlog2.f32 %v3242_v33  ;;  %v1155_v26 = vadd.f32 %v1154_v5, %v1153_v52 }
  0xe3   : > { %v1175_v57 = vrot.slane %v1174_v21, 1  ;;  %v1202_v37 = vadd.f32 %v1201_v49, %v1200_v58  ;;  %v1215_v7 = vrot.slane %v1214_v40, 2  ;;  %v1182_v47 = vrot.slane %v1181_v61, 1  ;;  %v3998_v49 = vld [vmem:[#allocation19_spill] sm:$0xff] }
  0xe4   : > { %v1209_v28 = vadd.f32 %v1208_v50, %v1207_v6  ;;  %v1221_v56 = vadd.f32 %v1220_v29, %v1219_v43  ;;  %2195 = vlog2.f32 %v3244_v48  ;;  %v1162_v13 = vadd.f32 %v1161_v35, %v1160_v36  ;;  %v3993_v36 = vld [vmem:[#allocation14_spill] sm:$0xff] }
  0xe5   : > { %v1189_v11 = vrot.slane %v1188_v38, 1  ;;  %v1216_v22 = vadd.f32 %v1215_v7, %v1214_v40  ;;  %2197 = vlog2.f32 %v3248_v19  ;;  %v1169_v51 = vadd.f32 %v1168_v18, %v1167_v55  ;;  %v4000_v40 = vld [vmem:[#allocation21_spill] sm:$0xff] }
  0xe6   : > { %v1196_v15 = vrot.slane %v1195_v41, 1  ;;  %v1222_v10 = vrot.slane %v1221_v56, 2  ;;  %2199 = vlog2.f32 %v1141_v34  ;;  %v1176_v59 = vadd.f32 %v1175_v57, %v1174_v21  ;;  %v3994_v34 = vld [vmem:[#allocation15_spill] sm:$0xff]  ;;  %v3996_v21 = vld [vmem:[#allocation17_spill] sm:$0xff] }
  0xe7   : > { %v1203_v33 = vrot.slane %v1202_v37, 1  ;;  %2201 = vlog2.f32 %v1148_v32  ;;  %v1400_v58 = vrot.slane %v3119_v3, 5  ;;  %v1183_v52 = vadd.f32 %v1182_v47, %v1181_v61  ;;  %v3995_v3 = vld [vmem:[#allocation16_spill] sm:$0xff]  ;;  %v3997_v32 = vld [vmem:[#allocation18_spill] sm:$0xff]  ;;  %v4015_v7 = vld [vmem:[#allocation57_spill] sm:$0xff] }
  0xe8   : > { %v1210_v1 = vrot.slane %v1209_v28, 1  ;;  %v1223_v60 = vadd.f32 %v1222_v10, %v1221_v56  ;;  %2203 = vlog2.f32 %v1155_v26  ;;  %v1190_v54 = vadd.f32 %v1189_v11, %v1188_v38  ;;  %v3999_v38 = vld [vmem:[#allocation20_spill] sm:$0xff]  ;;  %v4001_v26 = vld [vmem:[#allocation22_spill] sm:$0xff]  ;;  %v4006_v10 = vld [vmem:[#allocation27_spill] sm:$0xff] }
  0xe9   : > { %v1217_v48 = vrot.slane %v1216_v22, 1  ;;  %2205 = vlog2.f32 %v1162_v13  ;;  %v1279_v23 = vrot.slane %v3993_v36, %v3223_v4  ;;  %v1197_v19 = vadd.f32 %v1196_v15, %v1195_v41  ;;  %v4004_v13 = vld [vmem:[#allocation25_spill] sm:$0xff] }
  0xea   : > { %v1224_v18 = vrot.slane %v1223_v60, 1  ;;  %2207 = vlog2.f32 %v1169_v51  ;;  %v1283_v55 = vrot.slane %v3994_v34, %v3223_v4  ;;  %v1204_v17 = vadd.f32 %v1203_v33, %v1202_v37  ;;  %v4002_v37 = vld [vmem:[#allocation23_spill] sm:$0xff]  ;;  %v4007_v33 = vld [vmem:[#allocation28_spill] sm:$0xff] }
  0xeb   : > { %2209 = vlog2.f32 %v1176_v59  ;;  %v1287_v5 = vrot.slane %v3995_v3, %v3223_v4  ;;  %v1291_v6 = vrot.slane %v3996_v21, %v3223_v4  ;;  %v1211_v62 = vadd.f32 %v1210_v1, %v1209_v28  ;;  %v4003_v28 = vld [vmem:[#allocation24_spill] sm:$0xff]  ;;  %v4012_v51 = vld [vmem:[#allocation67_spill] sm:$0xff] }
  0xec   : > { %2211 = vlog2.f32 %v1183_v52  ;;  %v1295_v61 = vrot.slane %v3997_v32, %v3223_v4  ;;  %v1299_v43 = vrot.slane %v3998_v49, %v3223_v4  ;;  %v1218_v35 = vadd.f32 %v1217_v48, %v1216_v22  ;;  %v4005_v22 = vld [vmem:[#allocation26_spill] sm:$0xff]  ;;  %v4032_v32 = vld [vmem:[#allocation61_spill] sm:$0xff] }
  0xed   : > { %2213 = vlog2.f32 %v1190_v54  ;;  %v1303_v50 = vrot.slane %v3999_v38, %v3223_v4  ;;  %v1307_v41 = vrot.slane %v4000_v40, %v3223_v4  ;;  %v1225_v29 = vadd.f32 %v1224_v18, %v1223_v60  ;;  %v4008_v60 = vld [vmem:[#allocation29_spill] sm:$0xff]  ;;  %v2241_v18 = vld [vmem:[%s2334_s20 + $0x50] sm:$0x1] }
  0xee   : > { %2215 = vlog2.f32 %v1197_v19  ;;  %v4009_v48 = vrot.slane %v2857_v20, 5  ;;  %v4010_v36 = vrot.slane %v3108_v42, 5  ;;  %v1401_v34 = vrot.slane %v2241_v18, 5  ;;  %v2242_v20 = vld [vmem:[%s2334_s20 + $0x58] sm:$0x1]  ;;  %v4013_v18 = vld [vmem:[#allocation56_spill] sm:$0xff] }
  0xef   : > { %v2194_v47 = vpop.eup %2193  ;;  %2217 = vlog2.f32 %v1204_v17  ;;  %v1404_v42 = vrot.slane %v2242_v20, 5  ;;  %vm3333_vm5 = vcmp.eq.s32.totalorder %v3202_v27, %v1279_v23  ;;  %vm3345_vm6 = vcmp.eq.s32.totalorder %v3202_v27, %v1283_v55 }
  0xf0   : > { %v1227_v15 = vmul.f32 0.6931472, %v2194_v47  ;;  %2219 = vlog2.f32 %v1211_v62  ;;  %v3305_v19 = vsel %vm3842_vm3, %v4010_v36, %v4009_v48  ;;  %v4011_v47 = vld [vmem:[#allocation66_spill] sm:$0xff]  ;;  %v3313_v54 = vsel %vm3842_vm3, %v1400_v58, %v1401_v34 }
  0xf1   : > { %v2196_v1 = vpop.eup %2195  ;;  %2221 = vlog2.f32 %v1218_v35  ;;  %v1403_v35 = vrot.slane %v4011_v47, 5  ;;  %v1406_v48 = vrot.slane %v4012_v51, 5  ;;  %v1410_v34 = vrot.slane %v2901_v9, 5 }
  0xf2   : > { %v2198_v17 = vpop.eup %2197  ;;  %v1229_v3 = vmul.f32 0.6931472, %v2196_v1  ;;  %2223 = vlog2.f32 %v1225_v29  ;;  %v3309_v62 = vadd.f32 %v1227_v15, %v3023_v14  ;;  %v1407_v29 = vrot.slane %v2893_v25, 5  ;;  %v4014_v14 = vld [vmem:[#allocation68_spill] sm:$0xff] }
  0xf3   : > { %v2200_v52 = vpop.eup %2199  ;;  %v1231_v59 = vmul.f32 0.6931472, %v2198_v17  ;;  %v1409_v15 = vrot.slane %v4014_v14, 5  ;;  %v3326_v58 = vsel %vm3842_vm3, %v1403_v35, %v1404_v42  ;;  %v4020_v42 = vld [vmem:[#allocation59_spill] sm:$0xff]  ;;  %vm3350_vm7 = vcmp.eq.s32.totalorder %v3202_v27, %v1287_v5 }
  0xf4   : > { %v2202_v36 = vpop.eup %2201  ;;  %v1233_v11 = vmul.f32 0.6931472, %v2200_v52  ;;  %v3318_v56 = vadd.f32 %v1229_v3, %v4013_v18  ;;  %v4016_v52 = vld [vmem:[#allocation58_spill] sm:$0xff]  ;;  %v3338_v3 = vsel %vm3842_vm3, %v1406_v48, %v1407_v29  ;;  %v1413_v48 = vrot.slane %v2942_v2, 5 }
  0xf5   : > { %v2204_v1 = vpop.eup %2203  ;;  %v1235_v47 = vmul.f32 0.6931472, %v2202_v36  ;;  %v3323_v17 = vadd.f32 %v1231_v59, %v4015_v7  ;;  %v4019_v7 = vld [vmem:[#allocation9_spill] sm:$0xff]  ;;  %vm3365_vm8 = vcmp.eq.s32.totalorder %v3202_v27, %v1291_v6  ;;  %vm3373_vm9 = vcmp.eq.s32.totalorder %v3202_v27, %v1295_v61 }
  0xf6   : > { %v2206_v51 = vpop.eup %2205  ;;  %v1237_v20 = vmul.f32 0.6931472, %v2204_v1  ;;  %v3330_v57 = vadd.f32 %v1233_v11, %v4016_v52  ;;  %v1412_v59 = vrot.slane %v4019_v7, 5  ;;  %v3355_v11 = vsel %vm3842_vm3, %v1409_v15, %v1410_v34  ;;  %v4025_v1 = vld [vmem:[#allocation60_spill] sm:$0xff] }
  0xf7   : > { %v2208_v36 = vpop.eup %2207  ;;  %v1239_v35 = vmul.f32 0.6931472, %v2206_v51  ;;  %v3342_v18 = vadd.f32 %v1235_v47, %v4020_v42  ;;  %vm3381_vm10 = vcmp.eq.s32.totalorder %v3202_v27, %v1299_v43  ;;  %v1415_v21 = vrot.slane %v2985_v12, 5 }
  0xf8   : > { %v2210_v29 = vpop.eup %2209  ;;  %v1241_v14 = vmul.f32 0.6931472, %v2208_v36  ;;  %v3359_v47 = vadd.f32 %v1237_v20, %v4025_v1  ;;  %v1416_v6 = vrot.slane %v2955_v53, 5  ;;  %vm3394_vm11 = vcmp.eq.s32.totalorder %v3202_v27, %v1303_v50  ;;  %v4043_v20 = vld [vmem:[#allocation62_spill] sm:$0xff] }
  0xf9   : > { %v2212_v15 = vpop.eup %2211  ;;  %v1243_v34 = vmul.f32 0.6931472, %v2210_v29  ;;  %v3388_v51 = vadd.f32 %v1239_v35, %v4032_v32  ;;  %vm3402_vm12 = vcmp.eq.s32.totalorder %v3202_v27, %v1307_v41  ;;  %v4037_v53 = vrot.slane %v4001_v26, %v3223_v4 }
  0xfa   : > { %v4040_v43 = vrot.slane %v4002_v37, %v3223_v4  ;;  %v3423_v50 = vsel %vm3842_vm3, %v1412_v59, %v1413_v48  ;;  %v1418_v40 = vrot.slane %v2999_v16, 5  ;;  %v2214_v41 = vpop.eup %2213  ;;  %v1245_v26 = vmul.f32 0.6931472, %v2212_v15 }
  0xfb   : > { %vm3410_vm13 = vcmp.eq.s32.totalorder %v3202_v27, %v4037_v53  ;;  %v3427_v52 = vadd.f32 %v1241_v14, %v4043_v20  ;;  %v4044_v7 = vrot.slane %v4003_v28, %v3223_v4  ;;  %v4047_v36 = vrot.slane %v4004_v13, %v3223_v4  ;;  %v2216_v29 = vpop.eup %2215 }
  0xfc   : > { %vm3418_vm14 = vcmp.eq.s32.totalorder %v3202_v27, %v4040_v43  ;;  %v4050_v16 = vrot.slane %v4005_v22, %v3223_v4  ;;  %v4053_v28 = vrot.slane %v4006_v10, %v3223_v4  ;;  %v4054_v42 = vmov 0 }
  0xfd   : > { %vm3433_vm15 = vcmp.eq.s32.totalorder %v3202_v27, %v4044_v7  ;;  %vm3441_vm0 = vcmp.eq.s32.totalorder %v3202_v27, %v4047_v36  ;;  %v3462_v13 = vsel %vm3842_vm3, %v1415_v21, %v1416_v6  ;;  %v1419_v48 = vrot.slane %v2973_v45, 5  ;;  %v2218_v6 = vpop.eup %2217  ;;  %v4064_v7 = vld [vmem:[#allocation63_spill] sm:$0xff] }
  0xfe   : > { %vm3449_vm1 = vcmp.eq.s32.totalorder %v3202_v27, %v4050_v16  ;;  %vm3457_vm2 = vcmp.eq.s32.totalorder %v3202_v27, %v4053_v28  ;;  %v1247_v22 = vmul.f32 0.6931472, %v2214_v41  ;;  %v3466_v14 = vadd.f32 %v1243_v34, %v3078_v46  ;;  %v4066_v36 = vld [vmem:[#allocation51_spill] sm:$0xff] }
  0xff   : > { %v4055_v42 = vsel %vm3457_vm2, 4294967295, %v4054_v42  ;;  %v4056_v1 = vrot.slane %v4007_v33, %v3223_v4  ;;  %v4059_v15 = vrot.slane %v4008_v60, %v3223_v4  ;;  %v4060_v21 = vmov 0  ;;  %v2220_v4 = vpop.eup %2219 }
 0x100   : > { %v1421_v45 = vrot.slane %v3009_v8, 5  ;;  %v1422_v46 = vrot.slane %v2990_v30, 5  ;;  %v1249_v34 = vmul.f32 0.6931472, %v2216_v29  ;;  %v3487_v33 = vadd.f32 %v1245_v26, %v3080_v31  ;;  %v2222_v8 = vpop.eup %2221  ;;  %v4065_v26 = vld [vmem:[#allocation52_spill] sm:$0xff] }
 0x101   : > { %vm3472_vm4 = vcmp.eq.s32.totalorder %v3202_v27, %v4056_v1  ;;  %vm3480_vm3 = vcmp.eq.s32.totalorder %v3202_v27, %v4059_v15  ;;  %vm4062_vm2 = vcmask 1042432   ;;  %v1424_v53 = vrot.slane %v3016_v0, 5  ;;  %v2224_v0 = vpop.eup %2223  ;;  %v4069_v15 = vld [vmem:[#allocation65_spill] sm:$0xff] }
 0x102   : > { %v4061_v21 = vsel %vm3480_vm3, 4294967295, %v4060_v21  ;;  %v3490_v32 = vsel %vm4062_vm2, %v1418_v40, %v1419_v48  ;;  %v1251_v60 = vmul.f32 0.6931472, %v2218_v6  ;;  %v3494_v43 = vadd.f32 %v1247_v22, %v3082_v39  ;;  %vm4063_vm3 = vmmov %vm4062_vm2  ;;  %v4067_v48 = vld [vmem:[#allocation64_spill] sm:$0xff]  ;;  %v4068_v22 = vld [vmem:[#allocation54_spill] sm:$0xff] }
 0x103   : > { %v3497_v41 = vsel %vm4063_vm3, %v1421_v45, %v1422_v46  ;;  %v1425_v30 = vrot.slane %v3006_v24, 5  ;;  %v1253_v20 = vmul.f32 0.6931472, %v2220_v4  ;;  %v3501_v31 = vadd.f32 %v1249_v34, %v4064_v7  ;;  %vm4070_vm3 = vmmov %vm4062_vm2  ;;  %v4071_v6 = vld [vmem:[#allocation53_spill] sm:$0xff] }
 0x104   : > { %v1427_v40 = vrot.slane %v4065_v26, 5  ;;  %v1428_v16 = vrot.slane %v4066_v36, 5  ;;  %v1255_v28 = vmul.f32 0.6931472, %v2222_v8  ;;  %v3506_v29 = vadd.f32 %v1251_v60, %v4067_v48  ;;  %v4072_v4 = vld [vmem:[#allocation69_spill] sm:$0xff]  ;;  %v4073_v8 = vld [vmem:[#allocation55_spill] sm:$0xff] }
 0x105   : > { %v3509_v39 = vsel %vm4062_vm2, %v1424_v53, %v1425_v30  ;;  %v1430_v1 = vrot.slane %v4068_v22, 5  ;;  %v1257_v24 = vmul.f32 0.6931472, %v2224_v0  ;;  %v3513_v45 = vadd.f32 %v1253_v20, %v4069_v15  ;;  %v4074_v30 = vld [vmem:[#allocation70_spill] sm:$0xff]  ;;  %v4076_v0 = vld [vmem:[#allocation72_spill] sm:$0xff] }
 0x106   : > { %v3516_v46 = vsel %vm4070_vm3, %v1427_v40, %v1428_v16  ;;  %v1431_v34 = vrot.slane %v4071_v6, 5  ;;  %v3520_v7 = vadd.f32 %v1255_v28, %v4072_v4  ;;  %v1433_v60 = vrot.slane %v4073_v8, 5  ;;  %v4075_v40 = vld [vmem:[#allocation71_spill] sm:$0xff]  ;;  %vm4077_vm3 = vmmov %vm4062_vm2 }
 0x107   : > { %v1434_v26 = vrot.slane %v3039_v63, 5  ;;  %v1452_v53 = vsel %vm3333_vm5, %v3207_v44, 0.0  ;;  %v3528_v36 = vadd.f32 %v1257_v24, %v4074_v30  ;;  %v1453_v16 = vsel %vm3345_vm6, %v4075_v40, 0.0 }
 0x108   : > { %v3531_v20 = vsel %vm4062_vm2, %v1430_v1, %v1431_v34  ;;  %v1454_v28 = vsel %vm3350_vm7, %v4076_v0, 0.0  ;;  %v1455_v44 = vsel %vm3365_vm8, %v3305_v19, 0.0  ;;  %v1456_v25 = vsel %vm3373_vm9, %v3313_v54, 0.0 }
 0x109   : > { %v3540_v63 = vsel %vm4077_vm3, %v1433_v60, %v1434_v26  ;;  %v1457_v9 = vsel %vm3381_vm10, %v3326_v58, 0.0  ;;  %v1458_v23 = vsel %vm3394_vm11, %v3338_v3, 0.0  ;;  %v1459_v48 = vsel %vm3402_vm12, %v3355_v11, 0.0 }
 0x10a   : > { %v1460_v19 = vsel %vm3410_vm13, %v3423_v50, 0.0  ;;  %v1461_v54 = vsel %vm3418_vm14, %v3462_v13, 0.0  ;;  %v1462_v58 = vsel %vm3433_vm15, %v3490_v32, 0.0  ;;  %vm4078_vm5 = vnez %v4055_v42 }
 0x10b   : > { %vm4079_vm6 = vnez %v4061_v21  ;;  %vm4080_vm7 = vcmask 1043456   ;;  %v4095_v37 = vsel %vm4078_vm5, %v3516_v46, 0.0  ;;  %v4097_v42 = vsel %vm3472_vm4, %v3531_v20, 0.0 }
 0x10c   : > { %v1468_v61 = vsel %vm4080_vm7, %v1452_v53, 0.0  ;;  %vm4081_vm8 = vmmov %vm4080_vm7 }
 0x10d   : > { %v1475_v12 = vsel %vm4081_vm8, %v1453_v16, 0.0  ;;  %v1469_v49 = vrot.slane %v1468_v61, 4  ;;  %vm4082_vm9 = vmmov %vm4080_vm7 }
 0x10e   : > { %v1476_v38 = vrot.slane %v1475_v12, 4  ;;  %v1482_v50 = vsel %vm4082_vm9, %v1454_v28, 0.0  ;;  %vm4083_vm10 = vmmov %vm4080_vm7 }
 0x10f   : > { %v1489_v13 = vsel %vm4083_vm10, %v1455_v44, 0.0  ;;  %v1483_v22 = vrot.slane %v1482_v50, 4  ;;  %vm4084_vm11 = vmmov %vm4080_vm7  ;;  %v1470_v6 = vadd.f32 %v1469_v49, %v1468_v61 }
 0x110   : > { %v1490_v1 = vrot.slane %v1489_v13, 4  ;;  %v1496_v24 = vsel %vm4084_vm11, %v1456_v25, 0.0  ;;  %vm4085_vm12 = vmmov %vm4080_vm7  ;;  %v1477_v34 = vadd.f32 %v1476_v38, %v1475_v12 }
 0x111   : > { %v1503_v15 = vsel %vm4085_vm12, %v1457_v9, 0.0  ;;  %v1497_v4 = vrot.slane %v1496_v24, 4  ;;  %v1484_v60 = vadd.f32 %v1483_v22, %v1482_v50  ;;  %vm4086_vm13 = vmmov %vm4080_vm7  ;;  %v1471_v40 = vrot.slane %v1470_v6, 2 }
 0x112   : > { %v1504_v8 = vrot.slane %v1503_v15, 4  ;;  %v1491_v26 = vadd.f32 %v1490_v1, %v1489_v13  ;;  %v1510_v53 = vsel %vm4086_vm13, %v1458_v23, 0.0  ;;  %vm4087_vm14 = vmmov %vm4080_vm7  ;;  %v1478_v16 = vrot.slane %v1477_v34, 2 }
 0x113   : > { %v1517_v30 = vsel %vm4087_vm14, %v1459_v48, 0.0  ;;  %v1498_v0 = vadd.f32 %v1497_v4, %v1496_v24  ;;  %v1485_v44 = vrot.slane %v1484_v60, 2  ;;  %v1511_v5 = vrot.slane %v1510_v53, 4  ;;  %vm4088_vm2 = vmmov %vm4080_vm7 }
 0x114   : > { %v1505_v28 = vadd.f32 %v1504_v8, %v1503_v15  ;;  %v1492_v2 = vrot.slane %v1491_v26, 2  ;;  %v1518_v25 = vrot.slane %v1517_v30, 4  ;;  %v1472_v55 = vadd.f32 %v1471_v40, %v1470_v6  ;;  %vm4089_vm3 = vmmov %vm4088_vm2 }
 0x115   : > { %v1479_v9 = vadd.f32 %v1478_v16, %v1477_v34  ;;  %v1499_v61 = vrot.slane %v1498_v0, 2  ;;  %v1486_v49 = vadd.f32 %v1485_v44, %v1484_v60  ;;  %v1512_v50 = vadd.f32 %v1511_v5, %v1510_v53  ;;  %vm4090_vm7 = vmmov %vm4088_vm2 }
 0x116   : > { %v1506_v12 = vrot.slane %v1505_v28, 2  ;;  %v1493_v38 = vadd.f32 %v1492_v2, %v1491_v26  ;;  %v1519_v13 = vadd.f32 %v1518_v25, %v1517_v30  ;;  %v1473_v22 = vrot.slane %v1472_v55, 1  ;;  %vm4092_vm8 = vmmov %vm4088_vm2 }
 0x117   : > { %v1480_v23 = vrot.slane %v1479_v9, 1  ;;  %v1500_v1 = vadd.f32 %v1499_v61, %v1498_v0  ;;  %v1487_v11 = vrot.slane %v1486_v49, 1  ;;  %v1513_v24 = vrot.slane %v1512_v50, 2  ;;  %vm4094_vm9 = vmmov %vm4088_vm2 }
 0x118   : > { %v1507_v48 = vadd.f32 %v1506_v12, %v1505_v28  ;;  %v1494_v3 = vrot.slane %v1493_v38, 1  ;;  %v1520_v15 = vrot.slane %v1519_v13, 2  ;;  %v3589_v4 = vadd.f32 %v1473_v22, %v1472_v55  ;;  %vm4096_vm10 = vmmov %vm4088_vm2 }
 0x119   : > { %v3591_v8 = vadd.f32 %v1480_v23, %v1479_v9  ;;  %v1501_v6 = vrot.slane %v1500_v1, 1  ;;  %v3593_v40 = vadd.f32 %v1487_v11, %v1486_v49  ;;  %v1514_v5 = vadd.f32 %v1513_v24, %v1512_v50  ;;  %vm4098_vm15 = vmmov %vm4088_vm2 }
 0x11a   : > { %v1508_v34 = vrot.slane %v1507_v48, 1  ;;  %v3595_v60 = vadd.f32 %v1494_v3, %v1493_v38  ;;  %v1521_v2 = vadd.f32 %v1520_v15, %v1519_v13  ;;  %v1524_v30 = vsel %vm4088_vm2, %v1460_v19, 0.0 }
 0x11b   : > { %v3597_v26 = vadd.f32 %v1501_v6, %v1500_v1  ;;  %v1531_v16 = vsel %vm4089_vm3, %v1461_v54, 0.0  ;;  %v1515_v55 = vrot.slane %v1514_v5, 1  ;;  %v1525_v28 = vrot.slane %v1524_v30, 4 }
 0x11c   : > { %v3599_v53 = vadd.f32 %v1508_v34, %v1507_v48  ;;  %v1522_v0 = vrot.slane %v1521_v2, 1  ;;  %v1532_v44 = vrot.slane %v1531_v16, 4  ;;  %v1538_v3 = vsel %vm4090_vm7, %v1462_v58, 0.0 }
 0x11d   : > { %v4091_v11 = vsel %vm3441_vm0, %v3497_v41, 0.0  ;;  %v4093_v19 = vsel %vm3449_vm1, %v3509_v39, 0.0  ;;  %v1559_v32 = vsel %vm4096_vm10, %v4095_v37, 0.0  ;;  %v3623_v9 = vadd.f32 %v1515_v55, %v1514_v5  ;;  %vm4100_vm0 = vmmov %vm4088_vm2 }
 0x11e   : > { %v1545_v25 = vsel %vm4092_vm8, %v4091_v11, 0.0  ;;  %v1552_v54 = vsel %vm4094_vm9, %v4093_v19, 0.0  ;;  %v3625_v58 = vadd.f32 %v1522_v0, %v1521_v2  ;;  %v1526_v59 = vadd.f32 %v1525_v28, %v1524_v30 }
 0x11f   : > { %v1533_v41 = vadd.f32 %v1532_v44, %v1531_v16  ;;  %v1539_v61 = vrot.slane %v1538_v3, 4  ;;  %v1546_v12 = vrot.slane %v1545_v25, 4  ;;  %v1553_v49 = vrot.slane %v1552_v54, 4 }
 0x120   : > { %v1560_v35 = vrot.slane %v1559_v32, 4  ;;  %v1527_v38 = vrot.slane %v1526_v59, 2  ;;  %v1566_v46 = vsel %vm4098_vm15, %v4097_v42, 0.0  ;;  %v4099_v50 = vsel %vm4079_vm6, %v3540_v63, 0.0 }
 0x121   : > { %v1534_v39 = vrot.slane %v1533_v41, 2  ;;  %v1573_v13 = vsel %vm4100_vm0, %v4099_v50, 0.0  ;;  %v1540_v22 = vadd.f32 %v1539_v61, %v1538_v3  ;;  %v1547_v23 = vadd.f32 %v1546_v12, %v1545_v25 }
 0x122   : > { %v1554_v1 = vadd.f32 %v1553_v49, %v1552_v54  ;;  %v1561_v48 = vadd.f32 %v1560_v35, %v1559_v32  ;;  %v1528_v24 = vadd.f32 %v1527_v38, %v1526_v59  ;;  %v1567_v6 = vrot.slane %v1566_v46, 4 }
 0x123   : > { %v1535_v15 = vadd.f32 %v1534_v39, %v1533_v41  ;;  %v1574_v34 = vrot.slane %v1573_v13, 4  ;;  %v1541_v5 = vrot.slane %v1540_v22, 2  ;;  %v1548_v10 = vrot.slane %v1547_v23, 2 }
 0x124   : > { %v1555_v2 = vrot.slane %v1554_v1, 2  ;;  %v1562_v20 = vrot.slane %v1561_v48, 2  ;;  %v1529_v30 = vrot.slane %v1528_v24, 1  ;;  %v1568_v55 = vadd.f32 %v1567_v6, %v1566_v46 }
 0x125   : > { %v1536_v16 = vrot.slane %v1535_v15, 1  ;;  %v1575_v21 = vadd.f32 %v1574_v34, %v1573_v13  ;;  %v1542_v0 = vadd.f32 %v1541_v5, %v1540_v22  ;;  %v1549_v63 = vadd.f32 %v1548_v10, %v1547_v23  ;;  %v2251_v34 = vld [vmem:[%s2339_s24 + $0x40] sm:$0xff]  ;;  %v2252_v10 = vld [vmem:[%s2339_s24 + $0x48] sm:$0xff] }
 0x126   : > { %v1556_v28 = vadd.f32 %v1555_v2, %v1554_v1  ;;  %v1563_v44 = vadd.f32 %v1562_v20, %v1561_v48  ;;  %v1530_v3 = vadd.f32 %v1529_v30, %v1528_v24  ;;  %v1569_v25 = vrot.slane %v1568_v55, 2  ;;  %v2249_v48 = vld [vmem:[%s2339_s24 + $0x30] sm:$0xff] }
 0x127   : > { %v1537_v11 = vadd.f32 %v1536_v16, %v1535_v15  ;;  %v1576_v19 = vrot.slane %v1575_v21, 2  ;;  %v1543_v54 = vrot.slane %v1542_v0, 1  ;;  %v1550_v37 = vrot.slane %v1549_v63, 1  ;;  %v2250_v15 = vld [vmem:[%s2339_s24 + $0x38] sm:$0xff]  ;;  %v2253_v20 = vld [vmem:[%s2339_s24 + $0x50] sm:$0xff] }
 0x128   : > { %v1557_v32 = vrot.slane %v1556_v28, 1  ;;  %v1564_v59 = vrot.slane %v1563_v44, 1  ;;  %v1570_v41 = vadd.f32 %v1569_v25, %v1568_v55  ;;  %v1580_v12 = vsub.f32 %v3309_v62, %v3589_v4  ;;  %v2254_v16 = vld [vmem:[%s2339_s24 + $0x58] sm:$0xff] }
 0x129   : > { %v1577_v61 = vadd.f32 %v1576_v19, %v1575_v21  ;;  %v1581_v49 = vsub.f32 %v3318_v56, %v3591_v8  ;;  %v1544_v35 = vadd.f32 %v1543_v54, %v1542_v0  ;;  %v1551_v38 = vadd.f32 %v1550_v37, %v1549_v63  ;;  %v2255_v21 = vld [vmem:[%s2339_s24 + $0x60] sm:$0xff]  ;;  %v2256_v63 = vld [vmem:[%s2339_s24 + $0x68] sm:$0xff]  ;;  %v4101_v19 = vld [vmem:[#allocation32_spill] sm:$0xff] }
 0x12a   : > { %v1558_v39 = vadd.f32 %v1557_v32, %v1556_v28  ;;  %v1565_v42 = vadd.f32 %v1564_v59, %v1563_v44  ;;  %v1571_v46 = vrot.slane %v1570_v41, 1  ;;  %v1582_v13 = vsub.f32 %v3323_v17, %v3593_v40  ;;  %v2257_v44 = vld [vmem:[%s2339_s24 + $0x70] sm:$0xff]  ;;  %v4102_v37 = vld [vmem:[#allocation33_spill] sm:$0xff] }
 0x12b   : > { %v1578_v50 = vrot.slane %v1577_v61, 1  ;;  %v1583_v22 = vsub.f32 %v3330_v57, %v3595_v60  ;;  %v1584_v23 = vsub.f32 %v3342_v18, %v3597_v26  ;;  %v1585_v56 = vsub.f32 %v3359_v47, %v3599_v53  ;;  %v2243_v53 = vld [vmem:[%s2339_s24] sm:$0xff]  ;;  %v4103_v59 = vld [vmem:[#allocation40_spill] sm:$0xff] }
 0x12c   : > { %v1586_v62 = vsub.f32 %v3388_v51, %v3623_v9  ;;  %v1587_v4 = vsub.f32 %v3427_v52, %v3625_v58  ;;  %v1572_v8 = vadd.f32 %v1571_v46, %v1570_v41  ;;  %v1588_v40 = vsub.f32 %v3466_v14, %v1530_v3  ;;  %v2245_v9 = vld [vmem:[%s2339_s24 + $0x10] sm:$0xff] }
 0x12d   : > { %v1579_v17 = vadd.f32 %v1578_v50, %v1577_v61  ;;  %v1589_v57 = vsub.f32 %v3487_v33, %v1537_v11  ;;  %v1590_v18 = vsub.f32 %v3494_v43, %v1544_v35  ;;  %v1591_v47 = vsub.f32 %v3501_v31, %v1551_v38  ;;  %v2244_v33 = vld [vmem:[%s2339_s24 + $0x8] sm:$0xff]  ;;  %v2258_v11 = vld [vmem:[%s2339_s24 + $0x78] sm:$0xff]  ;;  %v4104_v61 = vld [vmem:[#allocation34_spill] sm:$0xff] }
 0x12e   : > { %v1592_v60 = vsub.f32 %v3506_v29, %v1558_v39  ;;  %v1593_v51 = vsub.f32 %v3513_v45, %v1565_v42  ;;  %v1594_v52 = vsub.f32 %v3520_v7, %v1572_v8  ;;  %v3662_v14 = vmul.f32 %v2243_v53, %v1580_v12  ;;  %v2246_v29 = vld [vmem:[%s2339_s24 + $0x18] sm:$0xff]  ;;  %v2247_v7 = vld [vmem:[%s2339_s24 + $0x20] sm:$0xff]  ;;  %v4106_v38 = vld [vmem:[#allocation36_spill] sm:$0xff] }
 0x12f   : > { %v1595_v26 = vsub.f32 %v3528_v36, %v1579_v17  ;;  %v3665_v43 = vmul.f32 %v2244_v33, %v1581_v49  ;;  %v3668_v31 = vmul.f32 %v2245_v9, %v1582_v13  ;;  %v3671_v45 = vmul.f32 %v2246_v29, %v1583_v22  ;;  %v2248_v36 = vld [vmem:[%s2339_s24 + $0x28] sm:$0xff]  ;;  %v4107_v42 = vld [vmem:[#allocation37_spill] sm:$0xff]  ;;  %v4109_v22 = vld [vmem:[#allocation38_spill] sm:$0xff] }
 0x130   : > { %v3674_v58 = vmul.f32 %v2247_v7, %v1584_v23  ;;  %v3677_v1 = vmul.f32 %v2248_v36, %v1585_v56  ;;  %v3680_v24 = vmul.f32 %v2249_v48, %v1586_v62  ;;  %v3683_v6 = vmul.f32 %v2250_v15, %v1587_v4  ;;  %v4105_v49 = vld [vmem:[#allocation35_spill] sm:$0xff]  ;;  %v4110_v56 = vld [vmem:[#allocation2_spill] sm:$0xff]  ;;  %v4112_v17 = vld [vmem:[#allocation4_spill] sm:$0xff] }
 0x131   : > { %v3686_v5 = vmul.f32 %v2251_v34, %v1588_v40  ;;  %v3689_v2 = vmul.f32 %v2252_v10, %v1589_v57  ;;  %v3692_v30 = vmul.f32 %v2253_v20, %v1590_v18  ;;  %v3695_v55 = vmul.f32 %v2254_v16, %v1591_v47  ;;  %v4108_v50 = vld [vmem:[#allocation39_spill] sm:$0xff]  ;;  %v4113_v57 = vld [vmem:[#allocation5_spill] sm:$0xff]  ;;  %v4114_v47 = vld [vmem:[#allocation6_spill] sm:$0xff] }
 0x132   : > { %v3698_v0 = vmul.f32 %v2255_v21, %v1592_v60  ;;  %v3701_v28 = vmul.f32 %v2256_v63, %v1593_v51  ;;  %v3704_v3 = vmul.f32 %v2257_v44, %v1594_v52  ;;  %v3707_v25 = vmul.f32 %v2258_v11, %v1595_v26  ;;  %v4111_v4 = vld [vmem:[#allocation3_spill] sm:$0xff]  ;;  %v4116_v26 = vld [vmem:[#allocation8_spill] sm:$0xff]  ;;  %v4117_v33 = vld [vmem:[#allocation41_spill] sm:$0xff] }
 0x133   : > { %v1628_v54 = vrot.slane %v4101_v19, 2  ;;  %v1629_v32 = vrot.slane %v4102_v37, 2  ;;  %v1630_v41 = vrot.slane %v4103_v59, 2  ;;  %v1631_v12 = vrot.slane %v4104_v61, 2  ;;  %v4115_v51 = vld [vmem:[#allocation7_spill] sm:$0xff]  ;;  %v4118_v29 = vld [vmem:[#allocation42_spill] sm:$0xff] }
 0x134   : > { %v1632_v35 = vrot.slane %v4105_v49, 2  ;;  %v1633_v39 = vrot.slane %v4106_v38, 2  ;;  %v1634_v46 = vrot.slane %v4107_v42, 2  ;;  %v1635_v13 = vrot.slane %v4108_v50, 2  ;;  %v4119_v36 = vld [vmem:[#allocation43_spill] sm:$0xff]  ;;  %v4120_v15 = vld [vmem:[#allocation44_spill] sm:$0xff] }
 0x135   : > { %v1636_v23 = vrot.slane %v4109_v22, 2  ;;  %v1637_v62 = vrot.slane %v4110_v56, 2  ;;  %v1638_v8 = vrot.slane %v4111_v4, 2  ;;  %v1639_v40 = vrot.slane %v4112_v17, 2  ;;  %v4121_v10 = vld [vmem:[#allocation45_spill] sm:$0xff]  ;;  %v4122_v16 = vld [vmem:[#allocation10_spill] sm:$0xff] }
 0x136   : > { %v1640_v18 = vrot.slane %v4113_v57, 2  ;;  %v1641_v60 = vrot.slane %v4114_v47, 2  ;;  %v1642_v52 = vrot.slane %v4115_v51, 2  ;;  %v1643_v53 = vrot.slane %v4116_v26, 2  ;;  %v4123_v63 = vld [vmem:[#allocation11_spill] sm:$0xff]  ;;  %v4124_v11 = vld [vmem:[#allocation12_spill] sm:$0xff] }
 0x137   : > { %v1660_v9 = vadd.f32 %v1628_v54, %v4117_v33  ;;  %v1661_v7 = vadd.f32 %v1629_v32, %v4118_v29  ;;  %v1662_v48 = vadd.f32 %v1630_v41, %v4119_v36  ;;  %v1663_v34 = vadd.f32 %v1631_v12, %v4120_v15  ;;  %v4125_v37 = vld [vmem:[#allocation13_spill] sm:$0xff]  ;;  %v4126_v61 = vld [vmem:[#allocation46_spill] sm:$0xff]  ;;  %v4127_v38 = vld [vmem:[#allocation47_spill] sm:$0xff] }
 0x138   : > { %v1664_v20 = vadd.f32 %v1632_v35, %v4121_v10  ;;  %v1665_v21 = vadd.f32 %v1633_v39, %v4122_v16  ;;  %v1666_v44 = vadd.f32 %v1634_v46, %v4123_v63  ;;  %v1667_v19 = vadd.f32 %v1635_v13, %v4124_v11  ;;  %v4128_v42 = vld [vmem:[#allocation48_spill] sm:$0xff]  ;;  %v4129_v50 = vld [vmem:[#allocation49_spill] sm:$0xff]  ;;  %v4130_v22 = vld [vmem:[#allocation50_spill] sm:$0xff] }
 0x139   : > { %v1668_v59 = vadd.f32 %v1636_v23, %v4125_v37  ;;  %v1669_v49 = vadd.f32 %v1637_v62, %v4126_v61  ;;  %v1670_v54 = vadd.f32 %v1638_v8, %v4127_v38  ;;  %v1671_v32 = vadd.f32 %v1639_v40, %v4128_v42  ;;  %v4131_v56 = vld [vmem:[#allocation30_spill] sm:$0xff]  ;;  %v4132_v4 = vld [vmem:[#allocation31_spill] sm:$0xff] }
 0x13a   : > { %v1672_v41 = vadd.f32 %v1640_v18, %v4129_v50  ;;  %v1673_v12 = vadd.f32 %v1641_v60, %v4130_v22  ;;  %v1674_v35 = vadd.f32 %v1642_v52, %v4131_v56  ;;  %v1675_v39 = vadd.f32 %v1643_v53, %v4132_v4  ;;  %v1749_v42 = vld [vmem:[%s2321_s16 + $0x1] sm:$0x1]  ;;  %v1751_v56 = vld [vmem:[%s2321_s16 + $0x3] sm:$0x1] }
 0x13b   : > { %v1692_v46 = vrot.slane %v3662_v14, 1  ;;  %v1693_v13 = vrot.slane %v3665_v43, 1  ;;  %v1694_v23 = vrot.slane %v3668_v31, 1  ;;  %v1695_v62 = vrot.slane %v3671_v45, 1 }
 0x13c   : > { %v1696_v8 = vrot.slane %v3674_v58, 1  ;;  %v1697_v17 = vrot.slane %v3677_v1, 1  ;;  %v1698_v40 = vrot.slane %v3680_v24, 1  ;;  %v1699_v57 = vrot.slane %v3683_v6, 1 }
 0x13d   : > { %v1700_v18 = vrot.slane %v3686_v5, 1  ;;  %v1701_v47 = vrot.slane %v3689_v2, 1  ;;  %v1702_v14 = vrot.slane %v3692_v30, 1  ;;  %v1703_v43 = vrot.slane %v3695_v55, 1 }
 0x13e   : > { %v1704_v31 = vrot.slane %v3698_v0, 1  ;;  %v1705_v45 = vrot.slane %v3701_v28, 1  ;;  %v1706_v58 = vrot.slane %v3704_v3, 1  ;;  %v1707_v1 = vrot.slane %v3707_v25, 1 }
 0x13f   : > { %v1724_v60 = vadd.f32 %v1692_v46, %v1660_v9  ;;  %v1725_v24 = vadd.f32 %v1693_v13, %v1661_v7  ;;  %v1726_v51 = vadd.f32 %v1694_v23, %v1662_v48  ;;  %v1727_v6 = vadd.f32 %v1695_v62, %v1663_v34  ;;  %v1753_v23 = vld [vmem:[%s2321_s16 + $0x5] sm:$0x1]  ;;  %v1754_v62 = vld [vmem:[%s2321_s16 + $0x6] sm:$0x1] }
 0x140   : > { %v1728_v52 = vadd.f32 %v1696_v8, %v1664_v20  ;;  %v1729_v5 = vadd.f32 %v1697_v17, %v1665_v21  ;;  %v1730_v26 = vadd.f32 %v1698_v40, %v1666_v44  ;;  %v1731_v2 = vadd.f32 %v1699_v57, %v1667_v19  ;;  %v1755_v8 = vld [vmem:[%s2321_s16 + $0x7] sm:$0x1] }
 0x141   : > { %v1732_v53 = vadd.f32 %v1700_v18, %v1668_v59  ;;  %v1733_v30 = vadd.f32 %v1701_v47, %v1669_v49  ;;  %v1734_v33 = vadd.f32 %v1702_v14, %v1670_v54  ;;  %v1735_v55 = vadd.f32 %v1703_v43, %v1671_v32  ;;  %v1748_v54 = vld [vmem:[%s2321_s16] sm:$0x1] }
 0x142   : > { %v1736_v29 = vadd.f32 %v1704_v31, %v1672_v41  ;;  %v1737_v0 = vadd.f32 %v1705_v45, %v1673_v12  ;;  %v1738_v36 = vadd.f32 %v1706_v58, %v1674_v35  ;;  %v1739_v28 = vadd.f32 %v1707_v1, %v1675_v39  ;;  %v1750_v12 = vld [vmem:[%s2321_s16 + $0x2] sm:$0x1]  ;;  %v1752_v35 = vld [vmem:[%s2321_s16 + $0x4] sm:$0x1] }
 0x143   : > { %v1740_v15 = vadd.f32 %v1725_v24, %v1724_v60  ;;  %v1741_v3 = vadd.f32 %v1727_v6, %v1726_v51  ;;  %v1742_v10 = vadd.f32 %v1729_v5, %v1728_v52  ;;  %v1743_v25 = vadd.f32 %v1731_v2, %v1730_v26 }
 0x144   : > { %v1744_v9 = vadd.f32 %v1733_v30, %v1732_v53  ;;  %v1745_v7 = vadd.f32 %v1735_v55, %v1734_v33  ;;  %v1746_v48 = vadd.f32 %v1737_v0, %v1736_v29  ;;  %v1747_v34 = vadd.f32 %v1739_v28, %v1738_v36 }
 0x145   : > { %v2284_v20 = vmov 1966171168   ;;  %v1764_v21 = vcombine.high %v1740_v15, %v1740_v15  ;;  %v1779_v44 = vcombine.high %v1741_v3, %v1741_v3  ;;  %v1794_v11 = vcombine.high %v1742_v10, %v1742_v10 }
 0x146   : > { %v1766_v16 = vunpack.c.l.s4 %v2284_v20  ;;  %v1809_v19 = vcombine.high %v1743_v25, %v1743_v25  ;;  %v1824_v37 = vcombine.high %v1744_v9, %v1744_v9  ;;  %v1839_v59 = vcombine.high %v1745_v7, %v1745_v7 }
 0x147   : > { %v1854_v61 = vcombine.high %v1746_v48, %v1746_v48  ;;  %v1869_v49 = vcombine.high %v1747_v34, %v1747_v34 }
 0x148   : > { %v1767_v63 = vunpack.c.0.s8 %v1766_v16 }
 0x14a   : > { %v1770_v38 = vsub.s32 %v1767_v63, %v3202_v27 }
 0x14c   : > { %v1771_v32 = vrot.slane %v1764_v21, %v1770_v38  ;;  %v1786_v50 = vrot.slane %v1779_v44, %v1770_v38  ;;  %v1801_v41 = vrot.slane %v1794_v11, %v1770_v38  ;;  %v1816_v22 = vrot.slane %v1809_v19, %v1770_v38 }
 0x14d   : > { %v1831_v4 = vrot.slane %v1824_v37, %v1770_v38  ;;  %v1846_v39 = vrot.slane %v1839_v59, %v1770_v38  ;;  %v1861_v46 = vrot.slane %v1854_v61, %v1770_v38  ;;  %v1876_v13 = vrot.slane %v1869_v49, %v1770_v38 }
 0x14e   : > { %v1778_v17 = vrot.slane %v1771_v32, %v1770_v38  ;;  %v1793_v27 = vrot.slane %v1786_v50, %v1770_v38  ;;  %v1808_v40 = vrot.slane %v1801_v41, %v1770_v38  ;;  %v1823_v57 = vrot.slane %v1816_v22, %v1770_v38 }
 0x14f   : > { %v1838_v18 = vrot.slane %v1831_v4, %v1770_v38  ;;  %v1853_v47 = vrot.slane %v1846_v39, %v1770_v38  ;;  %v1868_v14 = vrot.slane %v1861_v46, %v1770_v38  ;;  %v1883_v43 = vrot.slane %v1876_v13, %v1770_v38 }
 0x150   : > { %v1892_v31 = vadd.f32 %v1778_v17, %v1748_v54  ;;  %v1893_v45 = vadd.f32 %v1793_v27, %v1749_v42  ;;  %v1894_v58 = vadd.f32 %v1808_v40, %v1750_v12  ;;  %v1895_v1 = vadd.f32 %v1823_v57, %v1751_v56 }
 0x151   : > { %v1896_v60 = vadd.f32 %v1838_v18, %v1752_v35  ;;  %v1897_v24 = vadd.f32 %v1853_v47, %v1753_v23  ;;  %v1898_v51 = vadd.f32 %v1868_v14, %v1754_v62  ;;  %v1899_v6 = vadd.f32 %v1883_v43, %v1755_v8 }
 0x152   : > { %1900 = vst [vmem:[%s2321_s16] sm:$0x1] %v1892_v31  ;;  %1901 = vst [vmem:[%s2321_s16 + $0x1] sm:$0x1] %v1893_v45 }
 0x153   : > { %1902 = vst [vmem:[%s2321_s16 + $0x2] sm:$0x1] %v1894_v58  ;;  %1903 = vst [vmem:[%s2321_s16 + $0x3] sm:$0x1] %v1895_v1 }
 0x154   : > { %1904 = vst [vmem:[%s2321_s16 + $0x4] sm:$0x1] %v1896_v60  ;;  %1905 = vst [vmem:[%s2321_s16 + $0x5] sm:$0x1] %v1897_v24 }
 0x155   : > { %1906 = vst [vmem:[%s2321_s16 + $0x6] sm:$0x1] %v1898_v51  ;;  %1907 = vst [vmem:[%s2321_s16 + $0x7] sm:$0x1] %v1899_v6 }
 0x156 PF: > { %s12_s11 = sadd.s32 1, %s2281_s11   ;;  %s4133_s9 = smov %s2277_s10 }
 0x157   : > { %p9_p5 = scmp.ge.s32.totalorder %s12_s11, 4   ;;  %s4134_s10 = smov %s4136_s12 }
 0x159   :  { %11 = sbr.rel (!%p9_p5) target bundleno = 2 (0x2), region = 65 }

</bundles_post_ra>
